<compile_context>
chip_gen: v6e
topology: v6e:2x2x1
jax: 0.10.0
libtpu: 0.0.40
codegen_flags: <defaults>
</compile_context>

<pallas_src>
import numpy as np
import jax
import jax.numpy as jnp
from jax import lax
from jax.experimental import pallas as pl
from jax.experimental.pallas import tpu as pltpu


# ---------------------------------------------------------------------------
# In-kernel helpers (pure matmul / elementwise — safe Mosaic ops only)
# ---------------------------------------------------------------------------
def _dot(a, b):
    return jnp.dot(a, b, preferred_element_type=jnp.float32)


def _conv_taps(v, sd, su, w0, w1, w2):
    """3x3 'same' conv on a (H, W*Cin) tile, channels merged on the lane axis.

    sd/su are (H, H) shift-down/up matrices (zero fill at the borders), the
    w0/w1/w2 are block-banded (W*Cin, W*Cout) matrices that encode the three
    horizontal taps and the horizontal zero padding.
    """
    vd = _dot(sd, v)            # row i <- v[i-1]   (top border = 0)
    vu = _dot(su, v)            # row i <- v[i+1]   (bottom border = 0)
    return _dot(vd, w0) + _dot(v, w1) + _dot(vu, w2)


def _pool2x2(v, row_e, row_o, col_e, col_o):
    """2x2 max pool via 0/1 selection matmuls + elementwise max (exact)."""
    m = jnp.maximum(_dot(row_e, v), _dot(row_o, v))        # (H/2, W*C)
    return jnp.maximum(_dot(m, col_e), _dot(m, col_o))     # (H/2, W/2*C)


def _upsample2x(v, row_dup, col_dup):
    """Nearest-neighbor 2x upsample via 0/1 duplication matmuls (exact)."""
    return _dot(_dot(row_dup, v), col_dup)


# ---------------------------------------------------------------------------
# The fused UNet kernel — one grid step = one batch element
# ---------------------------------------------------------------------------
def _unet_kernel(x_ref,
                 sd16_ref, su16_ref, sd8_ref, su8_ref,
                 w1a_ref, w1b_ref, w1c_ref, b1_ref,
                 p1re_ref, p1ro_ref, p1ce_ref, p1co_ref,
                 w2a_ref, w2b_ref, w2c_ref, b2_ref,
                 p2re_ref, p2ro_ref, p2ce_ref, p2co_ref,
                 u1r_ref, u1c_ref,
                 w3xa_ref, w3xb_ref, w3xc_ref,
                 w3sa_ref, w3sb_ref, w3sc_ref, b3_ref,
                 u2r_ref, u2c_ref,
                 w4xa_ref, w4xb_ref, w4xc_ref,
                 w4sa_ref, w4sb_ref, w4sc_ref, b4_ref,
                 o_ref):
    x0 = x_ref[0]                                  # (16, 16*4)   lane = w*C + c
    sd16 = sd16_ref[...]
    su16 = su16_ref[...]
    sd8 = sd8_ref[...]
    su8 = su8_ref[...]

    # ---- encoder stage 1: conv3x3(4->8) + ReLU, maxpool 2x2 ----
    y1 = jnp.maximum(
        _conv_taps(x0, sd16, su16, w1a_ref[...], w1b_ref[...], w1c_ref[...])
        + b1_ref[...], 0.0)                        # (16, 16*8) = 128 lanes
    p1 = _pool2x2(y1, p1re_ref[...], p1ro_ref[...],
                  p1ce_ref[...], p1co_ref[...])    # (8, 8*8)

    # ---- encoder stage 2: conv3x3(8->16) + ReLU, maxpool 2x2 ----
    y2 = jnp.maximum(
        _conv_taps(p1, sd8, su8, w2a_ref[...], w2b_ref[...], w2c_ref[...])
        + b2_ref[...], 0.0)                        # (8, 8*16) = 128 lanes
    p2 = _pool2x2(y2, p2re_ref[...], p2ro_ref[...],
                  p2ce_ref[...], p2co_ref[...])    # (4, 4*16)

    # ---- decoder stage 1: upsample x2, concat skip=p1, conv3x3(24->8) + ReLU ----
    # (channel concat is folded into the split weights: x-part + skip-part)
    u1 = _upsample2x(p2, u1r_ref[...], u1c_ref[...])           # (8, 8*16)
    y3 = jnp.maximum(
        _conv_taps(u1, sd8, su8, w3xa_ref[...], w3xb_ref[...], w3xc_ref[...])
        + _conv_taps(p1, sd8, su8, w3sa_ref[...], w3sb_ref[...], w3sc_ref[...])
        + b3_ref[...], 0.0)                        # (8, 8*8)

    # ---- decoder stage 2: upsample x2, concat skip=x0, conv3x3(12->4) + ReLU ----
    u2 = _upsample2x(y3, u2r_ref[...], u2c_ref[...])           # (16, 16*8)
    y4 = jnp.maximum(
        _conv_taps(u2, sd16, su16, w4xa_ref[...], w4xb_ref[...], w4xc_ref[...])
        + _conv_taps(x0, sd16, su16, w4sa_ref[...], w4sb_ref[...], w4sc_ref[...])
        + b4_ref[...], 0.0)                        # (16, 16*4)

    o_ref[0] = y4


# ---------------------------------------------------------------------------
# One-time parameter preparation (exact, numpy, outside jit)
# ---------------------------------------------------------------------------
def _banded_conv_mats(w_oihw, width):
    """3x3 conv (PyTorch OIHW weights) -> 3 block-banded (W*Cin, W*Cout) mats.

    mats[dy][win*Cin + ci, wout*Cout + co] = w[co, ci, dy, dx]  with
    dx = win - wout + 1 (only |win - wout| <= 1); out-of-range win blocks are
    simply absent, which reproduces zero padding along W exactly.
    """
    w = np.asarray(w_oihw, np.float32)              # (Cout, Cin, 3, 3)
    cout, cin = w.shape[0], w.shape[1]
    mats = []
    for dy in range(3):
        big = np.zeros((width, cin, width, cout), np.float32)
        for dx in range(3):
            blk = w[:, :, dy, dx].T                 # (Cin, Cout)
            for wo in range(width):
                wi = wo + dx - 1
                if 0 <= wi < width:
                    big[wi, :, wo, :] = blk
        mats.append(big.reshape(width * cin, width * cout))
    return mats


def _bias_row(b, width):
    return np.tile(np.asarray(b, np.float32), width)[None, :]   # (1, W*Cout)


def _shift_mats(h):
    # (sd @ v)[i] = v[i-1] (0 at i=0) ; (su @ v)[i] = v[i+1] (0 at i=h-1)
    return (np.eye(h, k=-1, dtype=np.float32),
            np.eye(h, k=1, dtype=np.float32))


def _pool_mats(h, width, c):
    row_e = np.eye(h, dtype=np.float32)[0::2]       # (h/2, h)
    row_o = np.eye(h, dtype=np.float32)[1::2]
    eye_c = np.eye(c, dtype=np.float32)
    col_e = np.kron(np.eye(width, dtype=np.float32)[:, 0::2], eye_c)   # (W*C, W/2*C)
    col_o = np.kron(np.eye(width, dtype=np.float32)[:, 1::2], eye_c)
    return row_e, row_o, col_e, col_o


def _upsample_mats(h, width, c):
    row_dup = np.repeat(np.eye(h, dtype=np.float32), 2, axis=0)        # (2h, h)
    col_dup = np.kron(np.repeat(np.eye(width, dtype=np.float32), 2, axis=1),
                      np.eye(c, dtype=np.float32))                     # (W*C, 2W*C)
    return row_dup, col_dup


def prepare_kernel_params(params, height=16, width=16):
    """Flatten PyTorch-layout conv params into the kernel's operand list."""
    (w1, b1), (w2, b2) = params["down"]
    (w3, b3), (w4, b4) = params["up"]
    c1 = w1.shape[0]            # 8
    c2 = w2.shape[0]            # 16
    c3 = w3.shape[0]            # 8

    h1, wd1 = height, width     # 16, 16
    h2, wd2 = h1 // 2, wd1 // 2  # 8, 8
    h3, wd3 = h2 // 2, wd2 // 2  # 4, 4

    sd16, su16 = _shift_mats(h1)
    sd8, su8 = _shift_mats(h2)

    conv1 = _banded_conv_mats(w1, wd1)              # (64, 128) x3
    conv2 = _banded_conv_mats(w2, wd2)              # (64, 128) x3
    # decoder conv 1: input channels = [upsampled (c2) | skip (c1)]
    conv3x = _banded_conv_mats(w3[:, :c2], wd2)     # (128, 64) x3
    conv3s = _banded_conv_mats(w3[:, c2:], wd2)     # (64, 64)  x3
    # decoder conv 2: input channels = [upsampled (c3) | skip (in_channels)]
    conv4x = _banded_conv_mats(w4[:, :c3], wd1)     # (128, 64) x3
    conv4s = _banded_conv_mats(w4[:, c3:], wd1)     # (64, 64)  x3

    pool1 = _pool_mats(h1, wd1, c1)
    pool2 = _pool_mats(h2, wd2, c2)
    up1 = _upsample_mats(h3, wd3, c2)
    up2 = _upsample_mats(h2, wd2, c3)

    flat = ([sd16, su16, sd8, su8]
            + conv1 + [_bias_row(b1, wd1)]
            + list(pool1)
            + conv2 + [_bias_row(b2, wd2)]
            + list(pool2)
            + list(up1)
            + conv3x + conv3s + [_bias_row(b3, wd2)]
            + list(up2)
            + conv4x + conv4s + [_bias_row(b4, wd1)])
    return tuple(jnp.asarray(a, jnp.float32) for a in flat)


# ---------------------------------------------------------------------------
# Public forward (NCHW in / NCHW out) — single fused pallas_call
# ---------------------------------------------------------------------------
def unet_forward(prepared, x_nchw):
    n, c, h, w = x_nchw.shape
    # NCHW -> per-image (H, W*C) tiles: channels sit on the 128-lane axis.
    x = jnp.transpose(x_nchw, (0, 2, 3, 1)).reshape(n, h, w * c)
    c_out = prepared[-1].shape[1] // w              # from the last bias row

    in_specs = [pl.BlockSpec((1, h, w * c), lambda i: (i, 0, 0))]
    in_specs += [pl.BlockSpec(p.shape, lambda i, nd=p.ndim: (0,) * nd)
                 for p in prepared]

    out = pl.pallas_call(
        _unet_kernel,
        out_shape=jax.ShapeDtypeStruct((n, h, w * c_out), jnp.float32),
        grid=(n,),
        in_specs=in_specs,
        out_specs=pl.BlockSpec((1, h, w * c_out), lambda i: (i, 0, 0)),
        compiler_params=pltpu.CompilerParams(
            dimension_semantics=("parallel",)),     # v7x: one image per TensorCore
    )(x, *prepared)

    return jnp.transpose(out.reshape(n, h, w, c_out), (0, 3, 1, 2))


# ---------------------------------------------------------------------------
# Parameters & pure-JAX reference
# ---------------------------------------------------------------------------
def init_unet_params(key, in_channels, down_channels, up_channels):
    """Deterministic synthetic parameters (PyTorch Conv2d weight layout)."""
    params = {"down": [], "up": []}
    c = in_channels
    enc_in = []
    for co in down_channels:
        enc_in.append(c)
        key, k1, k2 = jax.random.split(key, 3)
        w = jax.random.normal(k1, (co, c, 3, 3), jnp.float32) * 0.1
        b = jax.random.normal(k2, (co,), jnp.float32) * 0.01
        params["down"].append((w, b))
        c = co
    skip_channels = enc_in[::-1]
    for co, sk in zip(up_channels, skip_channels):
        ci = c + sk
        key, k1, k2 = jax.random.split(key, 3)
        w = jax.random.normal(k1, (co, ci, 3, 3), jnp.float32) * 0.1
        b = jax.random.normal(k2, (co,), jnp.float32) * 0.01
        params["up"].append((w, b))
        c = co
    return params


def unet_reference(params, x_nchw):
    """Pure-JAX (XLA) reference for correctness checking."""
    x = jnp.transpose(x_nchw, (0, 2, 3, 1))

    def conv(x, w, b):
        y = lax.conv_general_dilated(
            x, jnp.transpose(w, (2, 3, 1, 0)),      # OIHW -> HWIO
            window_strides=(1, 1), padding="SAME",
            dimension_numbers=("NHWC", "HWIO", "NHWC"),
            precision=lax.Precision.HIGHEST)
        return jax.nn.relu(y + b)

    def pool(x):
        return lax.reduce_window(x, -jnp.inf, lax.max,
                                 (1, 2, 2, 1), (1, 2, 2, 1), "VALID")

    def up(x):
        return jnp.repeat(jnp.repeat(x, 2, axis=1), 2, axis=2)

    stack = []
    for (w, b) in params["down"]:
        stack.append(x)
        x = pool(conv(x, w, b))
    for (w, b), skip in zip(params["up"], stack[::-1]):
        x = conv(jnp.concatenate([up(x), skip], axis=-1), w, b)
    return jnp.transpose(x, (0, 3, 1, 2))


# ---------------------------------------------------------------------------
if __name__ == "__main__":
    key = jax.random.PRNGKey(0)
    k_x, k_p = jax.random.split(key)

    # batch=2, in_channels=4, spatial 16x16 (NCHW, PyTorch convention)
    x = jax.random.normal(k_x, (2, 4, 16, 16), jnp.float32)

    params = init_unet_params(k_p, in_channels=4,
                              down_channels=[8, 16],
                              up_channels=[8, 4])
    prepared = prepare_kernel_params(params, height=16, width=16)

    fwd = jax.jit(unet_forward)
    out = jax.block_until_ready(fwd(prepared, x))
    assert out.shape == (2, 4, 16, 16), out.shape

    ref = jax.block_until_ready(unet_reference(params, x))
    max_err = float(jnp.max(jnp.abs(out - ref)))
    assert jnp.allclose(out, ref, atol=5e-4, rtol=5e-4), max_err

    print("KERNEL_OK")
</pallas_src>

<mosaic_0001>
module attributes {stable_mosaic.version = 11 : i64} {
  func.func @_unet_kernel(%arg0: i32, %arg1: memref<1x16x64xf32, #tpu.memory_space<vmem>>, %arg2: memref<16x16xf32, #tpu.memory_space<vmem>>, %arg3: memref<16x16xf32, #tpu.memory_space<vmem>>, %arg4: memref<8x8xf32, #tpu.memory_space<vmem>>, %arg5: memref<8x8xf32, #tpu.memory_space<vmem>>, %arg6: memref<64x128xf32, #tpu.memory_space<vmem>>, %arg7: memref<64x128xf32, #tpu.memory_space<vmem>>, %arg8: memref<64x128xf32, #tpu.memory_space<vmem>>, %arg9: memref<1x128xf32, #tpu.memory_space<vmem>>, %arg10: memref<8x16xf32, #tpu.memory_space<vmem>>, %arg11: memref<8x16xf32, #tpu.memory_space<vmem>>, %arg12: memref<128x64xf32, #tpu.memory_space<vmem>>, %arg13: memref<128x64xf32, #tpu.memory_space<vmem>>, %arg14: memref<64x128xf32, #tpu.memory_space<vmem>>, %arg15: memref<64x128xf32, #tpu.memory_space<vmem>>, %arg16: memref<64x128xf32, #tpu.memory_space<vmem>>, %arg17: memref<1x128xf32, #tpu.memory_space<vmem>>, %arg18: memref<4x8xf32, #tpu.memory_space<vmem>>, %arg19: memref<4x8xf32, #tpu.memory_space<vmem>>, %arg20: memref<128x64xf32, #tpu.memory_space<vmem>>, %arg21: memref<128x64xf32, #tpu.memory_space<vmem>>, %arg22: memref<8x4xf32, #tpu.memory_space<vmem>>, %arg23: memref<64x128xf32, #tpu.memory_space<vmem>>, %arg24: memref<128x64xf32, #tpu.memory_space<vmem>>, %arg25: memref<128x64xf32, #tpu.memory_space<vmem>>, %arg26: memref<128x64xf32, #tpu.memory_space<vmem>>, %arg27: memref<64x64xf32, #tpu.memory_space<vmem>>, %arg28: memref<64x64xf32, #tpu.memory_space<vmem>>, %arg29: memref<64x64xf32, #tpu.memory_space<vmem>>, %arg30: memref<1x64xf32, #tpu.memory_space<vmem>>, %arg31: memref<16x8xf32, #tpu.memory_space<vmem>>, %arg32: memref<64x128xf32, #tpu.memory_space<vmem>>, %arg33: memref<128x64xf32, #tpu.memory_space<vmem>>, %arg34: memref<128x64xf32, #tpu.memory_space<vmem>>, %arg35: memref<128x64xf32, #tpu.memory_space<vmem>>, %arg36: memref<64x64xf32, #tpu.memory_space<vmem>>, %arg37: memref<64x64xf32, #tpu.memory_space<vmem>>, %arg38: memref<64x64xf32, #tpu.memory_space<vmem>>, %arg39: memref<1x64xf32, #tpu.memory_space<vmem>>, %arg40: memref<1x16x64xf32, #tpu.memory_space<vmem>>) attributes {dimension_semantics = [#tpu.dimension_semantics<parallel>], iteration_bounds = array<i64: 2>, scalar_prefetch = 0 : i64, scratch_operands = 0 : i64, tpu.core_type = #tpu.core_type<tc>, window_params = [{transform_indices = @transform_0, window_bounds = array<i64: 1, 16, 64>}, {pipeline_mode = #tpu.pipeline_mode<synchronous>, transform_indices = @transform_1, window_bounds = array<i64: 16, 16>}, {pipeline_mode = #tpu.pipeline_mode<synchronous>, transform_indices = @transform_2, window_bounds = array<i64: 16, 16>}, {pipeline_mode = #tpu.pipeline_mode<synchronous>, transform_indices = @transform_3, window_bounds = array<i64: 8, 8>}, {pipeline_mode = #tpu.pipeline_mode<synchronous>, transform_indices = @transform_4, window_bounds = array<i64: 8, 8>}, {pipeline_mode = #tpu.pipeline_mode<synchronous>, transform_indices = @transform_5, window_bounds = array<i64: 64, 128>}, {pipeline_mode = #tpu.pipeline_mode<synchronous>, transform_indices = @transform_6, window_bounds = array<i64: 64, 128>}, {pipeline_mode = #tpu.pipeline_mode<synchronous>, transform_indices = @transform_7, window_bounds = array<i64: 64, 128>}, {pipeline_mode = #tpu.pipeline_mode<synchronous>, transform_indices = @transform_8, window_bounds = array<i64: 1, 128>}, {pipeline_mode = #tpu.pipeline_mode<synchronous>, transform_indices = @transform_9, window_bounds = array<i64: 8, 16>}, {pipeline_mode = #tpu.pipeline_mode<synchronous>, transform_indices = @transform_10, window_bounds = array<i64: 8, 16>}, {pipeline_mode = #tpu.pipeline_mode<synchronous>, transform_indices = @transform_11, window_bounds = array<i64: 128, 64>}, {pipeline_mode = #tpu.pipeline_mode<synchronous>, transform_indices = @transform_12, window_bounds = array<i64: 128, 64>}, {pipeline_mode = #tpu.pipeline_mode<synchronous>, transform_indices = @transform_13, window_bounds = array<i64: 64, 128>}, {pipeline_mode = #tpu.pipeline_mode<synchronous>, transform_indices = @transform_14, window_bounds = array<i64: 64, 128>}, {pipeline_mode = #tpu.pipeline_mode<synchronous>, transform_indices = @transform_15, window_bounds = array<i64: 64, 128>}, {pipeline_mode = #tpu.pipeline_mode<synchronous>, transform_indices = @transform_16, window_bounds = array<i64: 1, 128>}, {pipeline_mode = #tpu.pipeline_mode<synchronous>, transform_indices = @transform_17, window_bounds = array<i64: 4, 8>}, {pipeline_mode = #tpu.pipeline_mode<synchronous>, transform_indices = @transform_18, window_bounds = array<i64: 4, 8>}, {pipeline_mode = #tpu.pipeline_mode<synchronous>, transform_indices = @transform_19, window_bounds = array<i64: 128, 64>}, {pipeline_mode = #tpu.pipeline_mode<synchronous>, transform_indices = @transform_20, window_bounds = array<i64: 128, 64>}, {pipeline_mode = #tpu.pipeline_mode<synchronous>, transform_indices = @transform_21, window_bounds = array<i64: 8, 4>}, {pipeline_mode = #tpu.pipeline_mode<synchronous>, transform_indices = @transform_22, window_bounds = array<i64: 64, 128>}, {pipeline_mode = #tpu.pipeline_mode<synchronous>, transform_indices = @transform_23, window_bounds = array<i64: 128, 64>}, {pipeline_mode = #tpu.pipeline_mode<synchronous>, transform_indices = @transform_24, window_bounds = array<i64: 128, 64>}, {pipeline_mode = #tpu.pipeline_mode<synchronous>, transform_indices = @transform_25, window_bounds = array<i64: 128, 64>}, {pipeline_mode = #tpu.pipeline_mode<synchronous>, transform_indices = @transform_26, window_bounds = array<i64: 64, 64>}, {pipeline_mode = #tpu.pipeline_mode<synchronous>, transform_indices = @transform_27, window_bounds = array<i64: 64, 64>}, {pipeline_mode = #tpu.pipeline_mode<synchronous>, transform_indices = @transform_28, window_bounds = array<i64: 64, 64>}, {pipeline_mode = #tpu.pipeline_mode<synchronous>, transform_indices = @transform_29, window_bounds = array<i64: 1, 64>}, {pipeline_mode = #tpu.pipeline_mode<synchronous>, transform_indices = @transform_30, window_bounds = array<i64: 16, 8>}, {pipeline_mode = #tpu.pipeline_mode<synchronous>, transform_indices = @transform_31, window_bounds = array<i64: 64, 128>}, {pipeline_mode = #tpu.pipeline_mode<synchronous>, transform_indices = @transform_32, window_bounds = array<i64: 128, 64>}, {pipeline_mode = #tpu.pipeline_mode<synchronous>, transform_indices = @transform_33, window_bounds = array<i64: 128, 64>}, {pipeline_mode = #tpu.pipeline_mode<synchronous>, transform_indices = @transform_34, window_bounds = array<i64: 128, 64>}, {pipeline_mode = #tpu.pipeline_mode<synchronous>, transform_indices = @transform_35, window_bounds = array<i64: 64, 64>}, {pipeline_mode = #tpu.pipeline_mode<synchronous>, transform_indices = @transform_36, window_bounds = array<i64: 64, 64>}, {pipeline_mode = #tpu.pipeline_mode<synchronous>, transform_indices = @transform_37, window_bounds = array<i64: 64, 64>}, {pipeline_mode = #tpu.pipeline_mode<synchronous>, transform_indices = @transform_38, window_bounds = array<i64: 1, 64>}, {transform_indices = @transform_39, window_bounds = array<i64: 1, 16, 64>}]} {
    %c0 = arith.constant 0 : index
    %c0_0 = arith.constant 0 : index
    %c0_1 = arith.constant 0 : index
    %0 = vector.load %arg1[%c0, %c0_0, %c0_1] : memref<1x16x64xf32, #tpu.memory_space<vmem>>, vector<1x16x64xf32>
    %1 = vector.shape_cast %0 : vector<1x16x64xf32> to vector<16x64xf32>
    %c0_2 = arith.constant 0 : index
    %c0_3 = arith.constant 0 : index
    %2 = vector.load %arg2[%c0_2, %c0_3] : memref<16x16xf32, #tpu.memory_space<vmem>>, vector<16x16xf32>
    %c0_4 = arith.constant 0 : index
    %c0_5 = arith.constant 0 : index
    %3 = vector.load %arg3[%c0_4, %c0_5] : memref<16x16xf32, #tpu.memory_space<vmem>>, vector<16x16xf32>
    %c0_6 = arith.constant 0 : index
    %c0_7 = arith.constant 0 : index
    %4 = vector.load %arg4[%c0_6, %c0_7] : memref<8x8xf32, #tpu.memory_space<vmem>>, vector<8x8xf32>
    %c0_8 = arith.constant 0 : index
    %c0_9 = arith.constant 0 : index
    %5 = vector.load %arg5[%c0_8, %c0_9] : memref<8x8xf32, #tpu.memory_space<vmem>>, vector<8x8xf32>
    %c0_10 = arith.constant 0 : index
    %c0_11 = arith.constant 0 : index
    %6 = vector.load %arg6[%c0_10, %c0_11] : memref<64x128xf32, #tpu.memory_space<vmem>>, vector<64x128xf32>
    %c0_12 = arith.constant 0 : index
    %c0_13 = arith.constant 0 : index
    %7 = vector.load %arg7[%c0_12, %c0_13] : memref<64x128xf32, #tpu.memory_space<vmem>>, vector<64x128xf32>
    %c0_14 = arith.constant 0 : index
    %c0_15 = arith.constant 0 : index
    %8 = vector.load %arg8[%c0_14, %c0_15] : memref<64x128xf32, #tpu.memory_space<vmem>>, vector<64x128xf32>
    %cst = arith.constant dense<0.000000e+00> : vector<16x64xf32>
    %9 = tpu.matmul %2, %1, %cst {dimension_numbers = #tpu.dot_dimension_numbers<[1], [0], [0], [1], [0, 0, 1, 1], [], []>} : vector<16x16xf32>, vector<16x64xf32>, vector<16x64xf32> -> vector<16x64xf32>
    %cst_16 = arith.constant dense<0.000000e+00> : vector<16x64xf32>
    %10 = tpu.matmul %3, %1, %cst_16 {dimension_numbers = #tpu.dot_dimension_numbers<[1], [0], [0], [1], [0, 0, 1, 1], [], []>} : vector<16x16xf32>, vector<16x64xf32>, vector<16x64xf32> -> vector<16x64xf32>
    %cst_17 = arith.constant dense<0.000000e+00> : vector<16x128xf32>
    %11 = tpu.matmul %9, %6, %cst_17 {dimension_numbers = #tpu.dot_dimension_numbers<[1], [0], [0], [1], [0, 0, 1, 1], [], []>} : vector<16x64xf32>, vector<64x128xf32>, vector<16x128xf32> -> vector<16x128xf32>
    %cst_18 = arith.constant dense<0.000000e+00> : vector<16x128xf32>
    %12 = tpu.matmul %1, %7, %cst_18 {dimension_numbers = #tpu.dot_dimension_numbers<[1], [0], [0], [1], [0, 0, 1, 1], [], []>} : vector<16x64xf32>, vector<64x128xf32>, vector<16x128xf32> -> vector<16x128xf32>
    %13 = arith.addf %11, %12 : vector<16x128xf32>
    %cst_19 = arith.constant dense<0.000000e+00> : vector<16x128xf32>
    %14 = tpu.matmul %10, %8, %cst_19 {dimension_numbers = #tpu.dot_dimension_numbers<[1], [0], [0], [1], [0, 0, 1, 1], [], []>} : vector<16x64xf32>, vector<64x128xf32>, vector<16x128xf32> -> vector<16x128xf32>
    %15 = arith.addf %13, %14 : vector<16x128xf32>
    %c0_20 = arith.constant 0 : index
    %c0_21 = arith.constant 0 : index
    %16 = vector.load %arg9[%c0_20, %c0_21] : memref<1x128xf32, #tpu.memory_space<vmem>>, vector<1x128xf32>
    %17 = vector.broadcast %16 : vector<1x128xf32> to vector<16x128xf32>
    %18 = arith.addf %15, %17 : vector<16x128xf32>
    %cst_22 = arith.constant 0.000000e+00 : f32
    %19 = vector.broadcast %cst_22 : f32 to vector<16x128xf32>
    %20 = arith.maximumf %18, %19 : vector<16x128xf32>
    %c0_23 = arith.constant 0 : index
    %c0_24 = arith.constant 0 : index
    %21 = vector.load %arg10[%c0_23, %c0_24] : memref<8x16xf32, #tpu.memory_space<vmem>>, vector<8x16xf32>
    %c0_25 = arith.constant 0 : index
    %c0_26 = arith.constant 0 : index
    %22 = vector.load %arg11[%c0_25, %c0_26] : memref<8x16xf32, #tpu.memory_space<vmem>>, vector<8x16xf32>
    %c0_27 = arith.constant 0 : index
    %c0_28 = arith.constant 0 : index
    %23 = vector.load %arg12[%c0_27, %c0_28] : memref<128x64xf32, #tpu.memory_space<vmem>>, vector<128x64xf32>
    %c0_29 = arith.constant 0 : index
    %c0_30 = arith.constant 0 : index
    %24 = vector.load %arg13[%c0_29, %c0_30] : memref<128x64xf32, #tpu.memory_space<vmem>>, vector<128x64xf32>
    %cst_31 = arith.constant dense<0.000000e+00> : vector<8x128xf32>
    %25 = tpu.matmul %21, %20, %cst_31 {dimension_numbers = #tpu.dot_dimension_numbers<[1], [0], [0], [1], [0, 0, 1, 1], [], []>} : vector<8x16xf32>, vector<16x128xf32>, vector<8x128xf32> -> vector<8x128xf32>
    %cst_32 = arith.constant dense<0.000000e+00> : vector<8x128xf32>
    %26 = tpu.matmul %22, %20, %cst_32 {dimension_numbers = #tpu.dot_dimension_numbers<[1], [0], [0], [1], [0, 0, 1, 1], [], []>} : vector<8x16xf32>, vector<16x128xf32>, vector<8x128xf32> -> vector<8x128xf32>
    %27 = arith.maximumf %25, %26 : vector<8x128xf32>
    %cst_33 = arith.constant dense<0.000000e+00> : vector<8x64xf32>
    %28 = tpu.matmul %27, %23, %cst_33 {dimension_numbers = #tpu.dot_dimension_numbers<[1], [0], [0], [1], [0, 0, 1, 1], [], []>} : vector<8x128xf32>, vector<128x64xf32>, vector<8x64xf32> -> vector<8x64xf32>
    %cst_34 = arith.constant dense<0.000000e+00> : vector<8x64xf32>
    %29 = tpu.matmul %27, %24, %cst_34 {dimension_numbers = #tpu.dot_dimension_numbers<[1], [0], [0], [1], [0, 0, 1, 1], [], []>} : vector<8x128xf32>, vector<128x64xf32>, vector<8x64xf32> -> vector<8x64xf32>
    %30 = arith.maximumf %28, %29 : vector<8x64xf32>
    %c0_35 = arith.constant 0 : index
    %c0_36 = arith.constant 0 : index
    %31 = vector.load %arg14[%c0_35, %c0_36] : memref<64x128xf32, #tpu.memory_space<vmem>>, vector<64x128xf32>
    %c0_37 = arith.constant 0 : index
    %c0_38 = arith.constant 0 : index
    %32 = vector.load %arg15[%c0_37, %c0_38] : memref<64x128xf32, #tpu.memory_space<vmem>>, vector<64x128xf32>
    %c0_39 = arith.constant 0 : index
    %c0_40 = arith.constant 0 : index
    %33 = vector.load %arg16[%c0_39, %c0_40] : memref<64x128xf32, #tpu.memory_space<vmem>>, vector<64x128xf32>
    %cst_41 = arith.constant dense<0.000000e+00> : vector<8x64xf32>
    %34 = tpu.matmul %4, %30, %cst_41 {dimension_numbers = #tpu.dot_dimension_numbers<[1], [0], [0], [1], [0, 0, 1, 1], [], []>} : vector<8x8xf32>, vector<8x64xf32>, vector<8x64xf32> -> vector<8x64xf32>
    %cst_42 = arith.constant dense<0.000000e+00> : vector<8x64xf32>
    %35 = tpu.matmul %5, %30, %cst_42 {dimension_numbers = #tpu.dot_dimension_numbers<[1], [0], [0], [1], [0, 0, 1, 1], [], []>} : vector<8x8xf32>, vector<8x64xf32>, vector<8x64xf32> -> vector<8x64xf32>
    %cst_43 = arith.constant dense<0.000000e+00> : vector<8x128xf32>
    %36 = tpu.matmul %34, %31, %cst_43 {dimension_numbers = #tpu.dot_dimension_numbers<[1], [0], [0], [1], [0, 0, 1, 1], [], []>} : vector<8x64xf32>, vector<64x128xf32>, vector<8x128xf32> -> vector<8x128xf32>
    %cst_44 = arith.constant dense<0.000000e+00> : vector<8x128xf32>
    %37 = tpu.matmul %30, %32, %cst_44 {dimension_numbers = #tpu.dot_dimension_numbers<[1], [0], [0], [1], [0, 0, 1, 1], [], []>} : vector<8x64xf32>, vector<64x128xf32>, vector<8x128xf32> -> vector<8x128xf32>
    %38 = arith.addf %36, %37 : vector<8x128xf32>
    %cst_45 = arith.constant dense<0.000000e+00> : vector<8x128xf32>
    %39 = tpu.matmul %35, %33, %cst_45 {dimension_numbers = #tpu.dot_dimension_numbers<[1], [0], [0], [1], [0, 0, 1, 1], [], []>} : vector<8x64xf32>, vector<64x128xf32>, vector<8x128xf32> -> vector<8x128xf32>
    %40 = arith.addf %38, %39 : vector<8x128xf32>
    %c0_46 = arith.constant 0 : index
    %c0_47 = arith.constant 0 : index
    %41 = vector.load %arg17[%c0_46, %c0_47] : memref<1x128xf32, #tpu.memory_space<vmem>>, vector<1x128xf32>
    %42 = vector.broadcast %41 : vector<1x128xf32> to vector<8x128xf32>
    %43 = arith.addf %40, %42 : vector<8x128xf32>
    %cst_48 = arith.constant 0.000000e+00 : f32
    %44 = vector.broadcast %cst_48 : f32 to vector<8x128xf32>
    %45 = arith.maximumf %43, %44 : vector<8x128xf32>
    %c0_49 = arith.constant 0 : index
    %c0_50 = arith.constant 0 : index
    %46 = vector.load %arg18[%c0_49, %c0_50] : memref<4x8xf32, #tpu.memory_space<vmem>>, vector<4x8xf32>
    %c0_51 = arith.constant 0 : index
    %c0_52 = arith.constant 0 : index
    %47 = vector.load %arg19[%c0_51, %c0_52] : memref<4x8xf32, #tpu.memory_space<vmem>>, vector<4x8xf32>
    %c0_53 = arith.constant 0 : index
    %c0_54 = arith.constant 0 : index
    %48 = vector.load %arg20[%c0_53, %c0_54] : memref<128x64xf32, #tpu.memory_space<vmem>>, vector<128x64xf32>
    %c0_55 = arith.constant 0 : index
    %c0_56 = arith.constant 0 : index
    %49 = vector.load %arg21[%c0_55, %c0_56] : memref<128x64xf32, #tpu.memory_space<vmem>>, vector<128x64xf32>
    %cst_57 = arith.constant dense<0.000000e+00> : vector<4x128xf32>
    %50 = tpu.matmul %46, %45, %cst_57 {dimension_numbers = #tpu.dot_dimension_numbers<[1], [0], [0], [1], [0, 0, 1, 1], [], []>} : vector<4x8xf32>, vector<8x128xf32>, vector<4x128xf32> -> vector<4x128xf32>
    %cst_58 = arith.constant dense<0.000000e+00> : vector<4x128xf32>
    %51 = tpu.matmul %47, %45, %cst_58 {dimension_numbers = #tpu.dot_dimension_numbers<[1], [0], [0], [1], [0, 0, 1, 1], [], []>} : vector<4x8xf32>, vector<8x128xf32>, vector<4x128xf32> -> vector<4x128xf32>
    %52 = arith.maximumf %50, %51 : vector<4x128xf32>
    %cst_59 = arith.constant dense<0.000000e+00> : vector<4x64xf32>
    %53 = tpu.matmul %52, %48, %cst_59 {dimension_numbers = #tpu.dot_dimension_numbers<[1], [0], [0], [1], [0, 0, 1, 1], [], []>} : vector<4x128xf32>, vector<128x64xf32>, vector<4x64xf32> -> vector<4x64xf32>
    %cst_60 = arith.constant dense<0.000000e+00> : vector<4x64xf32>
    %54 = tpu.matmul %52, %49, %cst_60 {dimension_numbers = #tpu.dot_dimension_numbers<[1], [0], [0], [1], [0, 0, 1, 1], [], []>} : vector<4x128xf32>, vector<128x64xf32>, vector<4x64xf32> -> vector<4x64xf32>
    %55 = arith.maximumf %53, %54 : vector<4x64xf32>
    %c0_61 = arith.constant 0 : index
    %c0_62 = arith.constant 0 : index
    %56 = vector.load %arg22[%c0_61, %c0_62] : memref<8x4xf32, #tpu.memory_space<vmem>>, vector<8x4xf32>
    %c0_63 = arith.constant 0 : index
    %c0_64 = arith.constant 0 : index
    %57 = vector.load %arg23[%c0_63, %c0_64] : memref<64x128xf32, #tpu.memory_space<vmem>>, vector<64x128xf32>
    %cst_65 = arith.constant dense<0.000000e+00> : vector<8x64xf32>
    %58 = tpu.matmul %56, %55, %cst_65 {dimension_numbers = #tpu.dot_dimension_numbers<[1], [0], [0], [1], [0, 0, 1, 1], [], []>} : vector<8x4xf32>, vector<4x64xf32>, vector<8x64xf32> -> vector<8x64xf32>
    %cst_66 = arith.constant dense<0.000000e+00> : vector<8x128xf32>
    %59 = tpu.matmul %58, %57, %cst_66 {dimension_numbers = #tpu.dot_dimension_numbers<[1], [0], [0], [1], [0, 0, 1, 1], [], []>} : vector<8x64xf32>, vector<64x128xf32>, vector<8x128xf32> -> vector<8x128xf32>
    %c0_67 = arith.constant 0 : index
    %c0_68 = arith.constant 0 : index
    %60 = vector.load %arg24[%c0_67, %c0_68] : memref<128x64xf32, #tpu.memory_space<vmem>>, vector<128x64xf32>
    %c0_69 = arith.constant 0 : index
    %c0_70 = arith.constant 0 : index
    %61 = vector.load %arg25[%c0_69, %c0_70] : memref<128x64xf32, #tpu.memory_space<vmem>>, vector<128x64xf32>
    %c0_71 = arith.constant 0 : index
    %c0_72 = arith.constant 0 : index
    %62 = vector.load %arg26[%c0_71, %c0_72] : memref<128x64xf32, #tpu.memory_space<vmem>>, vector<128x64xf32>
    %cst_73 = arith.constant dense<0.000000e+00> : vector<8x128xf32>
    %63 = tpu.matmul %4, %59, %cst_73 {dimension_numbers = #tpu.dot_dimension_numbers<[1], [0], [0], [1], [0, 0, 1, 1], [], []>} : vector<8x8xf32>, vector<8x128xf32>, vector<8x128xf32> -> vector<8x128xf32>
    %cst_74 = arith.constant dense<0.000000e+00> : vector<8x128xf32>
    %64 = tpu.matmul %5, %59, %cst_74 {dimension_numbers = #tpu.dot_dimension_numbers<[1], [0], [0], [1], [0, 0, 1, 1], [], []>} : vector<8x8xf32>, vector<8x128xf32>, vector<8x128xf32> -> vector<8x128xf32>
    %cst_75 = arith.constant dense<0.000000e+00> : vector<8x64xf32>
    %65 = tpu.matmul %63, %60, %cst_75 {dimension_numbers = #tpu.dot_dimension_numbers<[1], [0], [0], [1], [0, 0, 1, 1], [], []>} : vector<8x128xf32>, vector<128x64xf32>, vector<8x64xf32> -> vector<8x64xf32>
    %cst_76 = arith.constant dense<0.000000e+00> : vector<8x64xf32>
    %66 = tpu.matmul %59, %61, %cst_76 {dimension_numbers = #tpu.dot_dimension_numbers<[1], [0], [0], [1], [0, 0, 1, 1], [], []>} : vector<8x128xf32>, vector<128x64xf32>, vector<8x64xf32> -> vector<8x64xf32>
    %67 = arith.addf %65, %66 : vector<8x64xf32>
    %cst_77 = arith.constant dense<0.000000e+00> : vector<8x64xf32>
    %68 = tpu.matmul %64, %62, %cst_77 {dimension_numbers = #tpu.dot_dimension_numbers<[1], [0], [0], [1], [0, 0, 1, 1], [], []>} : vector<8x128xf32>, vector<128x64xf32>, vector<8x64xf32> -> vector<8x64xf32>
    %69 = arith.addf %67, %68 : vector<8x64xf32>
    %c0_78 = arith.constant 0 : index
    %c0_79 = arith.constant 0 : index
    %70 = vector.load %arg27[%c0_78, %c0_79] : memref<64x64xf32, #tpu.memory_space<vmem>>, vector<64x64xf32>
    %c0_80 = arith.constant 0 : index
    %c0_81 = arith.constant 0 : index
    %71 = vector.load %arg28[%c0_80, %c0_81] : memref<64x64xf32, #tpu.memory_space<vmem>>, vector<64x64xf32>
    %c0_82 = arith.constant 0 : index
    %c0_83 = arith.constant 0 : index
    %72 = vector.load %arg29[%c0_82, %c0_83] : memref<64x64xf32, #tpu.memory_space<vmem>>, vector<64x64xf32>
    %cst_84 = arith.constant dense<0.000000e+00> : vector<8x64xf32>
    %73 = tpu.matmul %4, %30, %cst_84 {dimension_numbers = #tpu.dot_dimension_numbers<[1], [0], [0], [1], [0, 0, 1, 1], [], []>} : vector<8x8xf32>, vector<8x64xf32>, vector<8x64xf32> -> vector<8x64xf32>
    %cst_85 = arith.constant dense<0.000000e+00> : vector<8x64xf32>
    %74 = tpu.matmul %5, %30, %cst_85 {dimension_numbers = #tpu.dot_dimension_numbers<[1], [0], [0], [1], [0, 0, 1, 1], [], []>} : vector<8x8xf32>, vector<8x64xf32>, vector<8x64xf32> -> vector<8x64xf32>
    %cst_86 = arith.constant dense<0.000000e+00> : vector<8x64xf32>
    %75 = tpu.matmul %73, %70, %cst_86 {dimension_numbers = #tpu.dot_dimension_numbers<[1], [0], [0], [1], [0, 0, 1, 1], [], []>} : vector<8x64xf32>, vector<64x64xf32>, vector<8x64xf32> -> vector<8x64xf32>
    %cst_87 = arith.constant dense<0.000000e+00> : vector<8x64xf32>
    %76 = tpu.matmul %30, %71, %cst_87 {dimension_numbers = #tpu.dot_dimension_numbers<[1], [0], [0], [1], [0, 0, 1, 1], [], []>} : vector<8x64xf32>, vector<64x64xf32>, vector<8x64xf32> -> vector<8x64xf32>
    %77 = arith.addf %75, %76 : vector<8x64xf32>
    %cst_88 = arith.constant dense<0.000000e+00> : vector<8x64xf32>
    %78 = tpu.matmul %74, %72, %cst_88 {dimension_numbers = #tpu.dot_dimension_numbers<[1], [0], [0], [1], [0, 0, 1, 1], [], []>} : vector<8x64xf32>, vector<64x64xf32>, vector<8x64xf32> -> vector<8x64xf32>
    %79 = arith.addf %77, %78 : vector<8x64xf32>
    %80 = arith.addf %69, %79 : vector<8x64xf32>
    %c0_89 = arith.constant 0 : index
    %c0_90 = arith.constant 0 : index
    %81 = vector.load %arg30[%c0_89, %c0_90] : memref<1x64xf32, #tpu.memory_space<vmem>>, vector<1x64xf32>
    %82 = vector.broadcast %81 : vector<1x64xf32> to vector<8x64xf32>
    %83 = arith.addf %80, %82 : vector<8x64xf32>
    %cst_91 = arith.constant 0.000000e+00 : f32
    %84 = vector.broadcast %cst_91 : f32 to vector<8x64xf32>
    %85 = arith.maximumf %83, %84 : vector<8x64xf32>
    %c0_92 = arith.constant 0 : index
    %c0_93 = arith.constant 0 : index
    %86 = vector.load %arg31[%c0_92, %c0_93] : memref<16x8xf32, #tpu.memory_space<vmem>>, vector<16x8xf32>
    %c0_94 = arith.constant 0 : index
    %c0_95 = arith.constant 0 : index
    %87 = vector.load %arg32[%c0_94, %c0_95] : memref<64x128xf32, #tpu.memory_space<vmem>>, vector<64x128xf32>
    %cst_96 = arith.constant dense<0.000000e+00> : vector<16x64xf32>
    %88 = tpu.matmul %86, %85, %cst_96 {dimension_numbers = #tpu.dot_dimension_numbers<[1], [0], [0], [1], [0, 0, 1, 1], [], []>} : vector<16x8xf32>, vector<8x64xf32>, vector<16x64xf32> -> vector<16x64xf32>
    %cst_97 = arith.constant dense<0.000000e+00> : vector<16x128xf32>
    %89 = tpu.matmul %88, %87, %cst_97 {dimension_numbers = #tpu.dot_dimension_numbers<[1], [0], [0], [1], [0, 0, 1, 1], [], []>} : vector<16x64xf32>, vector<64x128xf32>, vector<16x128xf32> -> vector<16x128xf32>
    %c0_98 = arith.constant 0 : index
    %c0_99 = arith.constant 0 : index
    %90 = vector.load %arg33[%c0_98, %c0_99] : memref<128x64xf32, #tpu.memory_space<vmem>>, vector<128x64xf32>
    %c0_100 = arith.constant 0 : index
    %c0_101 = arith.constant 0 : index
    %91 = vector.load %arg34[%c0_100, %c0_101] : memref<128x64xf32, #tpu.memory_space<vmem>>, vector<128x64xf32>
    %c0_102 = arith.constant 0 : index
    %c0_103 = arith.constant 0 : index
    %92 = vector.load %arg35[%c0_102, %c0_103] : memref<128x64xf32, #tpu.memory_space<vmem>>, vector<128x64xf32>
    %cst_104 = arith.constant dense<0.000000e+00> : vector<16x128xf32>
    %93 = tpu.matmul %2, %89, %cst_104 {dimension_numbers = #tpu.dot_dimension_numbers<[1], [0], [0], [1], [0, 0, 1, 1], [], []>} : vector<16x16xf32>, vector<16x128xf32>, vector<16x128xf32> -> vector<16x128xf32>
    %cst_105 = arith.constant dense<0.000000e+00> : vector<16x128xf32>
    %94 = tpu.matmul %3, %89, %cst_105 {dimension_numbers = #tpu.dot_dimension_numbers<[1], [0], [0], [1], [0, 0, 1, 1], [], []>} : vector<16x16xf32>, vector<16x128xf32>, vector<16x128xf32> -> vector<16x128xf32>
    %cst_106 = arith.constant dense<0.000000e+00> : vector<16x64xf32>
    %95 = tpu.matmul %93, %90, %cst_106 {dimension_numbers = #tpu.dot_dimension_numbers<[1], [0], [0], [1], [0, 0, 1, 1], [], []>} : vector<16x128xf32>, vector<128x64xf32>, vector<16x64xf32> -> vector<16x64xf32>
    %cst_107 = arith.constant dense<0.000000e+00> : vector<16x64xf32>
    %96 = tpu.matmul %89, %91, %cst_107 {dimension_numbers = #tpu.dot_dimension_numbers<[1], [0], [0], [1], [0, 0, 1, 1], [], []>} : vector<16x128xf32>, vector<128x64xf32>, vector<16x64xf32> -> vector<16x64xf32>
    %97 = arith.addf %95, %96 : vector<16x64xf32>
    %cst_108 = arith.constant dense<0.000000e+00> : vector<16x64xf32>
    %98 = tpu.matmul %94, %92, %cst_108 {dimension_numbers = #tpu.dot_dimension_numbers<[1], [0], [0], [1], [0, 0, 1, 1], [], []>} : vector<16x128xf32>, vector<128x64xf32>, vector<16x64xf32> -> vector<16x64xf32>
    %99 = arith.addf %97, %98 : vector<16x64xf32>
    %c0_109 = arith.constant 0 : index
    %c0_110 = arith.constant 0 : index
    %100 = vector.load %arg36[%c0_109, %c0_110] : memref<64x64xf32, #tpu.memory_space<vmem>>, vector<64x64xf32>
    %c0_111 = arith.constant 0 : index
    %c0_112 = arith.constant 0 : index
    %101 = vector.load %arg37[%c0_111, %c0_112] : memref<64x64xf32, #tpu.memory_space<vmem>>, vector<64x64xf32>
    %c0_113 = arith.constant 0 : index
    %c0_114 = arith.constant 0 : index
    %102 = vector.load %arg38[%c0_113, %c0_114] : memref<64x64xf32, #tpu.memory_space<vmem>>, vector<64x64xf32>
    %cst_115 = arith.constant dense<0.000000e+00> : vector<16x64xf32>
    %103 = tpu.matmul %2, %1, %cst_115 {dimension_numbers = #tpu.dot_dimension_numbers<[1], [0], [0], [1], [0, 0, 1, 1], [], []>} : vector<16x16xf32>, vector<16x64xf32>, vector<16x64xf32> -> vector<16x64xf32>
    %cst_116 = arith.constant dense<0.000000e+00> : vector<16x64xf32>
    %104 = tpu.matmul %3, %1, %cst_116 {dimension_numbers = #tpu.dot_dimension_numbers<[1], [0], [0], [1], [0, 0, 1, 1], [], []>} : vector<16x16xf32>, vector<16x64xf32>, vector<16x64xf32> -> vector<16x64xf32>
    %cst_117 = arith.constant dense<0.000000e+00> : vector<16x64xf32>
    %105 = tpu.matmul %103, %100, %cst_117 {dimension_numbers = #tpu.dot_dimension_numbers<[1], [0], [0], [1], [0, 0, 1, 1], [], []>} : vector<16x64xf32>, vector<64x64xf32>, vector<16x64xf32> -> vector<16x64xf32>
    %cst_118 = arith.constant dense<0.000000e+00> : vector<16x64xf32>
    %106 = tpu.matmul %1, %101, %cst_118 {dimension_numbers = #tpu.dot_dimension_numbers<[1], [0], [0], [1], [0, 0, 1, 1], [], []>} : vector<16x64xf32>, vector<64x64xf32>, vector<16x64xf32> -> vector<16x64xf32>
    %107 = arith.addf %105, %106 : vector<16x64xf32>
    %cst_119 = arith.constant dense<0.000000e+00> : vector<16x64xf32>
    %108 = tpu.matmul %104, %102, %cst_119 {dimension_numbers = #tpu.dot_dimension_numbers<[1], [0], [0], [1], [0, 0, 1, 1], [], []>} : vector<16x64xf32>, vector<64x64xf32>, vector<16x64xf32> -> vector<16x64xf32>
    %109 = arith.addf %107, %108 : vector<16x64xf32>
    %110 = arith.addf %99, %109 : vector<16x64xf32>
    %c0_120 = arith.constant 0 : index
    %c0_121 = arith.constant 0 : index
    %111 = vector.load %arg39[%c0_120, %c0_121] : memref<1x64xf32, #tpu.memory_space<vmem>>, vector<1x64xf32>
    %112 = vector.broadcast %111 : vector<1x64xf32> to vector<16x64xf32>
    %113 = arith.addf %110, %112 : vector<16x64xf32>
    %cst_122 = arith.constant 0.000000e+00 : f32
    %114 = vector.broadcast %cst_122 : f32 to vector<16x64xf32>
    %115 = arith.maximumf %113, %114 : vector<16x64xf32>
    %c0_123 = arith.constant 0 : index
    %c0_124 = arith.constant 0 : index
    %c0_125 = arith.constant 0 : index
    %116 = vector.load %arg40[%c0_123, %c0_124, %c0_125] : memref<1x16x64xf32, #tpu.memory_space<vmem>>, vector<1x16x64xf32>
    %117 = vector.shape_cast %116 : vector<1x16x64xf32> to vector<16x64xf32>
    %118 = vector.shape_cast %115 : vector<16x64xf32> to vector<1x16x64xf32>
    tpu.vector_store %arg40[%c0_123, %c0_124, %c0_125], %118 {strides = array<i32>} : memref<1x16x64xf32, #tpu.memory_space<vmem>>, vector<1x16x64xf32>,
    return
  }
  func.func @transform_0(%arg0: i32) -> (i32, i32, i32) {
    %c0_i32 = arith.constant 0 : i32
    %c0_i32_0 = arith.constant 0 : i32
    %c0_i32_1 = arith.constant 0 : i32
    return %arg0, %c0_i32, %c0_i32_0 : i32, i32, i32
  }
  func.func @transform_1(%arg0: i32) -> (i32, i32) {
    %c0_i32 = arith.constant 0 : i32
    %c0_i32_0 = arith.constant 0 : i32
    %c0_i32_1 = arith.constant 0 : i32
    return %c0_i32, %c0_i32_0 : i32, i32
  }
  func.func @transform_2(%arg0: i32) -> (i32, i32) {
    %c0_i32 = arith.constant 0 : i32
    %c0_i32_0 = arith.constant 0 : i32
    %c0_i32_1 = arith.constant 0 : i32
    return %c0_i32, %c0_i32_0 : i32, i32
  }
  func.func @transform_3(%arg0: i32) -> (i32, i32) {
    %c0_i32 = arith.constant 0 : i32
    %c0_i32_0 = arith.constant 0 : i32
    %c0_i32_1 = arith.constant 0 : i32
    return %c0_i32, %c0_i32_0 : i32, i32
  }
  func.func @transform_4(%arg0: i32) -> (i32, i32) {
    %c0_i32 = arith.constant 0 : i32
    %c0_i32_0 = arith.constant 0 : i32
    %c0_i32_1 = arith.constant 0 : i32
    return %c0_i32, %c0_i32_0 : i32, i32
  }
  func.func @transform_5(%arg0: i32) -> (i32, i32) {
    %c0_i32 = arith.constant 0 : i32
    %c0_i32_0 = arith.constant 0 : i32
    %c0_i32_1 = arith.constant 0 : i32
    return %c0_i32, %c0_i32_0 : i32, i32
  }
  func.func @transform_6(%arg0: i32) -> (i32, i32) {
    %c0_i32 = arith.constant 0 : i32
    %c0_i32_0 = arith.constant 0 : i32
    %c0_i32_1 = arith.constant 0 : i32
    return %c0_i32, %c0_i32_0 : i32, i32
  }
  func.func @transform_7(%arg0: i32) -> (i32, i32) {
    %c0_i32 = arith.constant 0 : i32
    %c0_i32_0 = arith.constant 0 : i32
    %c0_i32_1 = arith.constant 0 : i32
    return %c0_i32, %c0_i32_0 : i32, i32
  }
  func.func @transform_8(%arg0: i32) -> (i32, i32) {
    %c0_i32 = arith.constant 0 : i32
    %c0_i32_0 = arith.constant 0 : i32
    %c0_i32_1 = arith.constant 0 : i32
    return %c0_i32, %c0_i32_0 : i32, i32
  }
  func.func @transform_9(%arg0: i32) -> (i32, i32) {
    %c0_i32 = arith.constant 0 : i32
    %c0_i32_0 = arith.constant 0 : i32
    %c0_i32_1 = arith.constant 0 : i32
    return %c0_i32, %c0_i32_0 : i32, i32
  }
  func.func @transform_10(%arg0: i32) -> (i32, i32) {
    %c0_i32 = arith.constant 0 : i32
    %c0_i32_0 = arith.constant 0 : i32
    %c0_i32_1 = arith.constant 0 : i32
    return %c0_i32, %c0_i32_0 : i32, i32
  }
  func.func @transform_11(%arg0: i32) -> (i32, i32) {
    %c0_i32 = arith.constant 0 : i32
    %c0_i32_0 = arith.constant 0 : i32
    %c0_i32_1 = arith.constant 0 : i32
    return %c0_i32, %c0_i32_0 : i32, i32
  }
  func.func @transform_12(%arg0: i32) -> (i32, i32) {
    %c0_i32 = arith.constant 0 : i32
    %c0_i32_0 = arith.constant 0 : i32
    %c0_i32_1 = arith.constant 0 : i32
    return %c0_i32, %c0_i32_0 : i32, i32
  }
  func.func @transform_13(%arg0: i32) -> (i32, i32) {
    %c0_i32 = arith.constant 0 : i32
    %c0_i32_0 = arith.constant 0 : i32
    %c0_i32_1 = arith.constant 0 : i32
    return %c0_i32, %c0_i32_0 : i32, i32
  }
  func.func @transform_14(%arg0: i32) -> (i32, i32) {
    %c0_i32 = arith.constant 0 : i32
    %c0_i32_0 = arith.constant 0 : i32
    %c0_i32_1 = arith.constant 0 : i32
    return %c0_i32, %c0_i32_0 : i32, i32
  }
  func.func @transform_15(%arg0: i32) -> (i32, i32) {
    %c0_i32 = arith.constant 0 : i32
    %c0_i32_0 = arith.constant 0 : i32
    %c0_i32_1 = arith.constant 0 : i32
    return %c0_i32, %c0_i32_0 : i32, i32
  }
  func.func @transform_16(%arg0: i32) -> (i32, i32) {
    %c0_i32 = arith.constant 0 : i32
    %c0_i32_0 = arith.constant 0 : i32
    %c0_i32_1 = arith.constant 0 : i32
    return %c0_i32, %c0_i32_0 : i32, i32
  }
  func.func @transform_17(%arg0: i32) -> (i32, i32) {
    %c0_i32 = arith.constant 0 : i32
    %c0_i32_0 = arith.constant 0 : i32
    %c0_i32_1 = arith.constant 0 : i32
    return %c0_i32, %c0_i32_0 : i32, i32
  }
  func.func @transform_18(%arg0: i32) -> (i32, i32) {
    %c0_i32 = arith.constant 0 : i32
    %c0_i32_0 = arith.constant 0 : i32
    %c0_i32_1 = arith.constant 0 : i32
    return %c0_i32, %c0_i32_0 : i32, i32
  }
  func.func @transform_19(%arg0: i32) -> (i32, i32) {
    %c0_i32 = arith.constant 0 : i32
    %c0_i32_0 = arith.constant 0 : i32
    %c0_i32_1 = arith.constant 0 : i32
    return %c0_i32, %c0_i32_0 : i32, i32
  }
  func.func @transform_20(%arg0: i32) -> (i32, i32) {
    %c0_i32 = arith.constant 0 : i32
    %c0_i32_0 = arith.constant 0 : i32
    %c0_i32_1 = arith.constant 0 : i32
    return %c0_i32, %c0_i32_0 : i32, i32
  }
  func.func @transform_21(%arg0: i32) -> (i32, i32) {
    %c0_i32 = arith.constant 0 : i32
    %c0_i32_0 = arith.constant 0 : i32
    %c0_i32_1 = arith.constant 0 : i32
    return %c0_i32, %c0_i32_0 : i32, i32
  }
  func.func @transform_22(%arg0: i32) -> (i32, i32) {
    %c0_i32 = arith.constant 0 : i32
    %c0_i32_0 = arith.constant 0 : i32
    %c0_i32_1 = arith.constant 0 : i32
    return %c0_i32, %c0_i32_0 : i32, i32
  }
  func.func @transform_23(%arg0: i32) -> (i32, i32) {
    %c0_i32 = arith.constant 0 : i32
    %c0_i32_0 = arith.constant 0 : i32
    %c0_i32_1 = arith.constant 0 : i32
    return %c0_i32, %c0_i32_0 : i32, i32
  }
  func.func @transform_24(%arg0: i32) -> (i32, i32) {
    %c0_i32 = arith.constant 0 : i32
    %c0_i32_0 = arith.constant 0 : i32
    %c0_i32_1 = arith.constant 0 : i32
    return %c0_i32, %c0_i32_0 : i32, i32
  }
  func.func @transform_25(%arg0: i32) -> (i32, i32) {
    %c0_i32 = arith.constant 0 : i32
    %c0_i32_0 = arith.constant 0 : i32
    %c0_i32_1 = arith.constant 0 : i32
    return %c0_i32, %c0_i32_0 : i32, i32
  }
  func.func @transform_26(%arg0: i32) -> (i32, i32) {
    %c0_i32 = arith.constant 0 : i32
    %c0_i32_0 = arith.constant 0 : i32
    %c0_i32_1 = arith.constant 0 : i32
    return %c0_i32, %c0_i32_0 : i32, i32
  }
  func.func @transform_27(%arg0: i32) -> (i32, i32) {
    %c0_i32 = arith.constant 0 : i32
    %c0_i32_0 = arith.constant 0 : i32
    %c0_i32_1 = arith.constant 0 : i32
    return %c0_i32, %c0_i32_0 : i32, i32
  }
  func.func @transform_28(%arg0: i32) -> (i32, i32) {
    %c0_i32 = arith.constant 0 : i32
    %c0_i32_0 = arith.constant 0 : i32
    %c0_i32_1 = arith.constant 0 : i32
    return %c0_i32, %c0_i32_0 : i32, i32
  }
  func.func @transform_29(%arg0: i32) -> (i32, i32) {
    %c0_i32 = arith.constant 0 : i32
    %c0_i32_0 = arith.constant 0 : i32
    %c0_i32_1 = arith.constant 0 : i32
    return %c0_i32, %c0_i32_0 : i32, i32
  }
  func.func @transform_30(%arg0: i32) -> (i32, i32) {
    %c0_i32 = arith.constant 0 : i32
    %c0_i32_0 = arith.constant 0 : i32
    %c0_i32_1 = arith.constant 0 : i32
    return %c0_i32, %c0_i32_0 : i32, i32
  }
  func.func @transform_31(%arg0: i32) -> (i32, i32) {
    %c0_i32 = arith.constant 0 : i32
    %c0_i32_0 = arith.constant 0 : i32
    %c0_i32_1 = arith.constant 0 : i32
    return %c0_i32, %c0_i32_0 : i32, i32
  }
  func.func @transform_32(%arg0: i32) -> (i32, i32) {
    %c0_i32 = arith.constant 0 : i32
    %c0_i32_0 = arith.constant 0 : i32
    %c0_i32_1 = arith.constant 0 : i32
    return %c0_i32, %c0_i32_0 : i32, i32
  }
  func.func @transform_33(%arg0: i32) -> (i32, i32) {
    %c0_i32 = arith.constant 0 : i32
    %c0_i32_0 = arith.constant 0 : i32
    %c0_i32_1 = arith.constant 0 : i32
    return %c0_i32, %c0_i32_0 : i32, i32
  }
  func.func @transform_34(%arg0: i32) -> (i32, i32) {
    %c0_i32 = arith.constant 0 : i32
    %c0_i32_0 = arith.constant 0 : i32
    %c0_i32_1 = arith.constant 0 : i32
    return %c0_i32, %c0_i32_0 : i32, i32
  }
  func.func @transform_35(%arg0: i32) -> (i32, i32) {
    %c0_i32 = arith.constant 0 : i32
    %c0_i32_0 = arith.constant 0 : i32
    %c0_i32_1 = arith.constant 0 : i32
    return %c0_i32, %c0_i32_0 : i32, i32
  }
  func.func @transform_36(%arg0: i32) -> (i32, i32) {
    %c0_i32 = arith.constant 0 : i32
    %c0_i32_0 = arith.constant 0 : i32
    %c0_i32_1 = arith.constant 0 : i32
    return %c0_i32, %c0_i32_0 : i32, i32
  }
  func.func @transform_37(%arg0: i32) -> (i32, i32) {
    %c0_i32 = arith.constant 0 : i32
    %c0_i32_0 = arith.constant 0 : i32
    %c0_i32_1 = arith.constant 0 : i32
    return %c0_i32, %c0_i32_0 : i32, i32
  }
  func.func @transform_38(%arg0: i32) -> (i32, i32) {
    %c0_i32 = arith.constant 0 : i32
    %c0_i32_0 = arith.constant 0 : i32
    %c0_i32_1 = arith.constant 0 : i32
    return %c0_i32, %c0_i32_0 : i32, i32
  }
  func.func @transform_39(%arg0: i32) -> (i32, i32, i32) {
    %c0_i32 = arith.constant 0 : i32
    %c0_i32_0 = arith.constant 0 : i32
    %c0_i32_1 = arith.constant 0 : i32
    return %arg0, %c0_i32, %c0_i32_0 : i32, i32, i32
  }
}

</mosaic_0001>

<bundles_post_ra>
// kernel: unet_forward.1
= control target key start
LH: loop header
LB: loop body
LE: loop exit
PB: predicated region body
PF: predicated region fallthrough
CT: control target
= control target key end

     0   :  { %s5604_s6 = smov 1   ;;  %s5605_s10 = smov 2   ;;  %s6485_s0 = inlined_call_operand.smem [shape: u32[40], index: -1, kind: input, shape index: {}] }
   0x1   :  { %s5653_s5 = sld [smem:[%s6485_s0]]   ;;  %s5606_s14 = smov 3  }
   0x2   :  { %s5658_s9 = sld [smem:[%s6485_s0 + %s5604_s6]]   ;;  %s5607_s18 = smov 4  }
   0x3   :  { %s5663_s13 = sld [smem:[%s6485_s0 + %s5605_s10]]   ;;  %s5608_s22 = smov 5  }
   0x4   :  { %s5668_s17 = sld [smem:[%s6485_s0 + %s5606_s14]]   ;;  %s5609_s26 = smov 6  }
   0x5   :  { %s5673_s21 = sld [smem:[%s6485_s0 + %s5607_s18]]   ;;  %s5610_s30 = smov 7  }
   0x6   :  { %s5678_s25 = sld [smem:[%s6485_s0 + %s5608_s22]]   ;;  %s5611_s4 = smov 8  }
   0x7   :  { %s5683_s29 = sld [smem:[%s6485_s0 + %s5609_s26]]   ;;  %s5612_s10 = smov 9  }
   0x8   :  { %s5688_s3 = sld [smem:[%s6485_s0 + %s5610_s30]]   ;;  %s5613_s15 = smov 10  }
   0x9   :  { %s5693_s8 = sld [smem:[%s6485_s0 + %s5611_s4]]   ;;  %s5614_s20 = smov 11  }
   0xa   :  { %s5698_s14 = sld [smem:[%s6485_s0 + %s5612_s10]]   ;;  %s5615_s26 = smov 12  }
   0xb   :  { %6510 = sst [smem:[#allocation2_spill]] %s5673_s21  ;;  %s5616_s1 = smov 13  }
   0xc   :  { %s5703_s19 = sld [smem:[%s6485_s0 + %s5613_s15]]   ;;  %s5617_s7 = smov 14  }
   0xd   :  { %s5708_s24 = sld [smem:[%s6485_s0 + %s5614_s20]]   ;;  %s5618_s15 = smov 15  }
   0xe   :  { %6511 = sst [smem:[#allocation3_spill]] %s5688_s3  ;;  %s5619_s22 = smov 16  }
   0xf   :  { %s5713_s30 = sld [smem:[%s6485_s0 + %s5615_s26]]   ;;  %s5620_s28 = smov 17  }
  0x10   :  { %s5718_s6 = sld [smem:[%s6485_s0 + %s5616_s1]]  }
  0x11   :  { %s5723_s12 = sld [smem:[%s6485_s0 + %s5617_s7]]   ;;  %s5621_s7 = smov 18  }
  0x12   :  { %s5728_s20 = sld [smem:[%s6485_s0 + %s5618_s15]]   ;;  %s5622_s15 = smov 19  }
  0x13   :  { %s5733_s27 = sld [smem:[%s6485_s0 + %s5619_s22]]   ;;  %s5623_s22 = smov 20  }
  0x14   :  { %s5738_s4 = sld [smem:[%s6485_s0 + %s5620_s28]]   ;;  %s5624_s28 = smov 21  }
  0x15   :  { %s5748_s21 = sld [smem:[%s6485_s0 + %s5622_s15]]   ;;  %s5626_s15 = smov 23  }
  0x16   :  { %6512 = sst [smem:[#allocation4_spill]] %s5718_s6 }
  0x17   :  { %s5743_s6 = sld [smem:[%s6485_s0 + %s5621_s7]]   ;;  %s5625_s7 = smov 22  }
  0x19   :  { %6513 = sst [smem:[#allocation5_spill]] %s5733_s27 }
  0x1a   :  { %6514 = sst [smem:[#allocation6_spill]] %s5738_s4 }
  0x1b   :  { %6516 = sst [smem:[#allocation8_spill]] %s5748_s21 }
  0x1c   :  { %s5753_s27 = sld [smem:[%s6485_s0 + %s5623_s22]]   ;;  %s5627_s22 = smov 24  }
  0x1d   :  { %6515 = sst [smem:[#allocation7_spill]] %s5743_s6 }
  0x1e   :  { %s5758_s4 = sld [smem:[%s6485_s0 + %s5624_s28]]   ;;  %s5628_s28 = smov 25  }
  0x1f   :  { %s5763_s6 = sld [smem:[%s6485_s0 + %s5625_s7]]   ;;  %s5629_s7 = smov 26  }
  0x20   :  { %s5768_s21 = sld [smem:[%s6485_s0 + %s5626_s15]]   ;;  %s5630_s15 = smov 27  }
  0x22   :  { %6517 = sst [smem:[#allocation9_spill]] %s5753_s27 }
  0x23   :  { %s5773_s27 = sld [smem:[%s6485_s0 + %s5627_s22]]   ;;  %s5631_s22 = smov 28  }
  0x24   :  { %6518 = sst [smem:[#allocation10_spill]] %s5758_s4 }
  0x25   :  { %6519 = sst [smem:[#allocation11_spill]] %s5763_s6 }
  0x26   :  { %6520 = sst [smem:[#allocation12_spill]] %s5768_s21 }
  0x27   :  { %s5778_s4 = sld [smem:[%s6485_s0 + %s5628_s28]]   ;;  %s5632_s28 = smov 29  }
  0x28   :  { %s5783_s6 = sld [smem:[%s6485_s0 + %s5629_s7]]   ;;  %s5633_s7 = smov 30  }
  0x29   :  { %6521 = sst [smem:[#allocation13_spill]] %s5773_s27 }
  0x2a   :  { %s5788_s21 = sld [smem:[%s6485_s0 + %s5630_s15]]   ;;  %s5634_s15 = smov 31  }
  0x2b   :  { %s5793_s27 = sld [smem:[%s6485_s0 + %s5631_s22]]   ;;  %s5635_s22 = smov 32  }
  0x2d   :  { %6522 = sst [smem:[#allocation14_spill]] %s5778_s4 }
  0x2e   :  { %6523 = sst [smem:[#allocation15_spill]] %s5783_s6 }
  0x2f   :  { %s5798_s4 = sld [smem:[%s6485_s0 + %s5632_s28]]   ;;  %s5636_s28 = smov 33  }
  0x30   :  { %6524 = sst [smem:[#allocation16_spill]] %s5788_s21 }
  0x31   :  { %6525 = sst [smem:[#allocation17_spill]] %s5793_s27 }
  0x32   :  { %s5803_s6 = sld [smem:[%s6485_s0 + %s5633_s7]]   ;;  %s5637_s7 = smov 34  }
  0x33   :  { %s5808_s21 = sld [smem:[%s6485_s0 + %s5634_s15]]   ;;  %s5638_s15 = smov 35  }
  0x34   :  { %s5813_s27 = sld [smem:[%s6485_s0 + %s5635_s22]]   ;;  %s5639_s22 = smov 36  }
  0x35   :  { %6526 = sst [smem:[#allocation18_spill]] %s5798_s4 }
  0x36   :  { %s5818_s4 = sld [smem:[%s6485_s0 + %s5636_s28]]   ;;  %s5640_s28 = smov 37  }
  0x38   :  { %6527 = sst [smem:[#allocation19_spill]] %s5803_s6 }
  0x39   :  { %6528 = sst [smem:[#allocation20_spill]] %s5808_s21 }
  0x3a   :  { %6529 = sst [smem:[#allocation21_spill]] %s5813_s27 }
  0x3b   :  { %s5823_s6 = sld [smem:[%s6485_s0 + %s5637_s7]]   ;;  %s5641_s7 = smov 38  }
  0x3c   :  { %6530 = sst [smem:[#allocation22_spill]] %s5818_s4 }
  0x3d   :  { %s5828_s21 = sld [smem:[%s6485_s0 + %s5638_s15]]   ;;  %s5642_s15 = smov 39  }
  0x3e   :  { %s5833_s27 = sld [smem:[%s6485_s0 + %s5639_s22]]   ;;  %s5850_s22 = smov 0  }
  0x3f   :  { %s5838_s4 = sld [smem:[%s6485_s0 + %s5640_s28]]  }
  0x41   :  { %6531 = sst [smem:[#allocation23_spill]] %s5823_s6 }
  0x42   :  { %s5843_s6 = sld [smem:[%s6485_s0 + %s5641_s7]]  }
  0x43   :  { %6532 = sst [smem:[#allocation24_spill]] %s5828_s21 }
  0x44   :  { %s5848_s21 = sld [smem:[%s6485_s0 + %s5642_s15]]  }
  0x45 LB: > { %s6533_s3 = sld [smem:[#allocation3_spill]]  ;;  %s4440_s23 = sadd.s32 4294967295, %s5602_s22   ;;  %s5602_s22 = sphi %s5850_s22, %s89_s22  }
  0x46   : > { %p4444_p0 = scmp.ge.s32.totalorder %s5602_s22, 1  ;;  %p1077_p1 = scmp.lt.s32.totalorder %s5602_s22, 3 }
  0x48   : > { %p1078_p2 = pnand %p4444_p0, %p1077_p1 }
  0x49   : > { %p1173_p3 = scmp.lt.s32.totalorder (!%p1078_p2), %s4440_s23, 1  ;;  %s6534_s28 = sld [smem:[#allocation2_spill]] (!%p1078_p2) }
  0x4a   : > { %1081 = sbr.rel (%p1078_p2) target bundleno = 3323 (0xcfb), region = 176  ;;  %s6535_s1 = sld [smem:[#allocation4_spill]] (!%p1078_p2) }
  0x4b   : > { %s6536_s2 = sld [smem:[#allocation9_spill]] (!%p1078_p2) }
  0x4c   : > { %s6537_s7 = sld [smem:[#allocation5_spill]] (!%p1078_p2) }
  0x4d   : > { %s6538_s10 = sld [smem:[#allocation6_spill]] (!%p1078_p2) }
  0x4e   : > { %s6539_s11 = sld [smem:[#allocation7_spill]] (!%p1078_p2) }
  0x4f   : > { %v1185_v0 = vld [vmem:[%s5658_s9] sm:$0xff]  ;;  %vm1215_vm0 = vcmask 130048   ;;  %v1206_v1 = vld [vmem:[%s5683_s29 + $0x38] sm:$0xff]  ;;  %v1205_v2 = vld [vmem:[%s5683_s29 + $0x30] sm:$0xff]  ;;  %s6558_s23 = smov (!%p1173_p3, %s4440_s23), 1  ;;  %vm1378_vm1 = vcmask 523264  }
  0x50   : > { %4847 = vmatprep.mubr.msk.f32.mxu1 %vm1215_vm0, %v1185_v0  ;;  %4857 = vmatprep.subr.mxu0 %v1206_v1  ;;  %v1204_v3 = vld [vmem:[%s5683_s29 + $0x28] sm:$0xff]  ;;  %s6502_s0 = sshll.u32 %s6558_s23, 4  ;;  %v1203_v4 = vld [vmem:[%s5683_s29 + $0x20] sm:$0xff]  ;;  %v1202_v7 = vld [vmem:[%s5683_s29 + $0x18] sm:$0xff]  ;;  %v5643_v34 = vmov 0.0   ;;  %vm5644_vm2 = vmmov 0  }
  0x51   : > { %4858 = vmatpush3.msra.mxu0 %v1206_v1  ;;  %s5869_s26 = scalar_lea.vmem %s5653_s5, %s6502_s0  ;;  %v1186_v8 = vld [vmem:[%s5658_s9 + $0x8] sm:$0xff]  ;;  %v1187_v9 = vld [vmem:[%s5663_s13] sm:$0xff]  ;;  %v1201_v10 = vld [vmem:[%s5683_s29 + $0x10] sm:$0xff]  ;;  %vm1981_vm3 = vcmask 64512   ;;  %s6540_s15 = sld [smem:[#allocation8_spill]]  ;;  %vm2692_vm4 = vcmask 1043456  }
  0x52   : > { %4859 = vmatprep.subr.mxu0 %v1205_v2  ;;  %v1184_v5 = vld [vmem:[%s5869_s26 + $0x8] sm:$0xff]  ;;  %v1183_v6 = vld [vmem:[%s5869_s26] sm:$0xff]  ;;  %v1198_v13 = vld [vmem:[%s5678_s25 + $0x38] sm:$0xff]  ;;  %s6541_s16 = sld [smem:[#allocation10_spill]]  ;;  %vm2688_vm5 = vcmask 31744  }
  0x53   : > { %4860 = vmatpush3.msra.mxu0 %v1205_v2  ;;  %4843 = vmatprep.subr.mxu1 %v1184_v5  ;;  %v1188_v11 = vld [vmem:[%s5663_s13 + $0x8] sm:$0xff]  ;;  %v1199_v14 = vld [vmem:[%s5683_s29] sm:$0xff]  ;;  %v1197_v15 = vld [vmem:[%s5678_s25 + $0x30] sm:$0xff]  ;;  %s6542_s18 = sld [smem:[#allocation11_spill]] }
  0x54   : > { %4861 = vmatprep.subr.mxu0 %v1204_v3  ;;  %4844 = vmatpush3.msra.mxu1 %v1184_v5  ;;  %v1200_v12 = vld [vmem:[%s5683_s29 + $0x8] sm:$0xff]  ;;  %v1214_v17 = vld [vmem:[%s6533_s3 + $0x38] sm:$0xff]  ;;  %v1195_v18 = vld [vmem:[%s5678_s25 + $0x20] sm:$0xff]  ;;  %s6548_s0 = sld [smem:[#allocation15_spill]] }
  0x55   : > { %4862 = vmatpush3.msra.mxu0 %v1204_v3  ;;  %4845 = vmatprep.subr.mxu1 %v1183_v6  ;;  %v1196_v16 = vld [vmem:[%s5678_s25 + $0x28] sm:$0xff]  ;;  %v1213_v19 = vld [vmem:[%s6533_s3 + $0x30] sm:$0xff]  ;;  %v1194_v20 = vld [vmem:[%s5678_s25 + $0x18] sm:$0xff] }
  0x56   : > { %4863 = vmatprep.subr.mxu0 %v1203_v4  ;;  %4846 = vmatpush3.msra.mxu1 %v1183_v6  ;;  %v1212_v21 = vld [vmem:[%s6533_s3 + $0x28] sm:$0xff]  ;;  %v1193_v22 = vld [vmem:[%s5678_s25 + $0x10] sm:$0xff]  ;;  %v1211_v23 = vld [vmem:[%s6533_s3 + $0x20] sm:$0xff] }
  0x57   : > { %4864 = vmatpush3.msra.mxu0 %v1203_v4  ;;  %4848 = vmatmul.mubr.msk.f32.vlgmr.msra.gmra.mxu1 %vm1215_vm0, %v1186_v8  ;;  %v1192_v24 = vld [vmem:[%s5678_s25 + $0x8] sm:$0xff]  ;;  %v1210_v25 = vld [vmem:[%s6533_s3 + $0x18] sm:$0xff]  ;;  %v1191_v26 = vld [vmem:[%s5678_s25] sm:$0xff] }
  0x58   : > { %4865 = vmatprep.subr.mxu0 %v1202_v7  ;;  %4850 = vmatprep.subr.mxu1 %v1184_v5  ;;  %v1209_v27 = vld [vmem:[%s6533_s3 + $0x10] sm:$0xff]  ;;  %v1208_v28 = vld [vmem:[%s6533_s3 + $0x8] sm:$0xff]  ;;  %v1207_v29 = vld [vmem:[%s6533_s3] sm:$0xff]  ;;  %s6551_s3 = sld [smem:[#allocation20_spill]] }
  0x59   : > { %4851 = vmatpush3.msra.mxu1 %v1184_v5  ;;  %4854 = vmatprep.mubr.msk.f32.mxu1 %vm1215_vm0, %v1187_v9  ;;  %v1668_v35 = vld [vmem:[%s5713_s30 + $0x78] sm:$0xff]  ;;  %v1667_v36 = vld [vmem:[%s5713_s30 + $0x70] sm:$0xff]  ;;  %v1666_v37 = vld [vmem:[%s5713_s30 + $0x68] sm:$0xff] }
  0x5a   : > { %4852 = vmatprep.subr.mxu1 %v1183_v6  ;;  %4866 = vmatpush3.msra.mxu0 %v1202_v7  ;;  %v1665_v38 = vld [vmem:[%s5713_s30 + $0x60] sm:$0xff]  ;;  %v1664_v39 = vld [vmem:[%s5713_s30 + $0x58] sm:$0xff]  ;;  %v1663_v40 = vld [vmem:[%s5713_s30 + $0x50] sm:$0xff] }
  0x5b   : > { %4853 = vmatpush3.msra.mxu1 %v1183_v6  ;;  %4867 = vmatprep.subr.mxu0 %v1201_v10  ;;  %v1662_v41 = vld [vmem:[%s5713_s30 + $0x48] sm:$0xff]  ;;  %v1661_v42 = vld [vmem:[%s5713_s30 + $0x40] sm:$0xff]  ;;  %v1660_v43 = vld [vmem:[%s5713_s30 + $0x38] sm:$0xff] }
  0x5c   : > { %4855 = vmatmul.mubr.msk.f32.vlgmr.msra.gmra.mxu1 %vm1215_vm0, %v1188_v11  ;;  %4868 = vmatpush3.msra.mxu0 %v1201_v10  ;;  %v1659_v44 = vld [vmem:[%s5713_s30 + $0x30] sm:$0xff]  ;;  %v1658_v45 = vld [vmem:[%s5713_s30 + $0x28] sm:$0xff]  ;;  %v1657_v46 = vld [vmem:[%s5713_s30 + $0x20] sm:$0xff] }
  0x5d   : > { %4869 = vmatprep.subr.mxu0 %v1200_v12  ;;  %4876 = vmatprep.subr.mxu1 %v1198_v13  ;;  %v4459_v53 = vld [vmem:[%s5693_s8] ss:$0 sm:$0xff]  ;;  %v1652_v0 = vld [vmem:[%s5708_s24 + $0x78] sm:$0xff]  ;;  %v1651_v1 = vld [vmem:[%s5708_s24 + $0x70] sm:$0xff] }
  0x5e   : > { %4870 = vmatpush3.msra.mxu0 %v1200_v12  ;;  %4877 = vmatpush3.msra.mxu1 %v1198_v13  ;;  %v1635_v62 = vld [vmem:[%s5698_s14] sm:$0xff]  ;;  %v1650_v2 = vld [vmem:[%s5708_s24 + $0x68] sm:$0xff]  ;;  %v1648_v4 = vld [vmem:[%s5708_s24 + $0x58] sm:$0xff] }
  0x5f   : > { %4871 = vmatprep.subr.mxu0 %v1199_v14  ;;  %4873 = vmatprep.mubr.msk.f32.mxu0 %vm1378_vm1, %v1183_v6  ;;  %v1636_v63 = vld [vmem:[%s5703_s19] sm:$0xff]  ;;  %v1646_v6 = vld [vmem:[%s5708_s24 + $0x48] sm:$0xff]  ;;  %v1644_v8 = vld [vmem:[%s5708_s24 + $0x38] sm:$0xff] }
  0x60   : > { %4872 = vmatpush3.msra.mxu0 %v1199_v14  ;;  %4878 = vmatprep.subr.mxu1 %v1197_v15  ;;  %v1649_v3 = vld [vmem:[%s5708_s24 + $0x60] sm:$0xff]  ;;  %v1643_v9 = vld [vmem:[%s5708_s24 + $0x30] sm:$0xff]  ;;  %v1642_v10 = vld [vmem:[%s5708_s24 + $0x28] sm:$0xff] }
  0x61   : > { %4874 = vmatmul.mubr.msk.f32.vlgmr.msra.gmra.mxu0 %vm1378_vm1, %v1184_v5  ;;  %4879 = vmatpush3.msra.mxu1 %v1197_v15  ;;  %v1647_v5 = vld [vmem:[%s5708_s24 + $0x50] sm:$0xff]  ;;  %v1645_v7 = vld [vmem:[%s5708_s24 + $0x40] sm:$0xff]  ;;  %v1640_v12 = vld [vmem:[%s5708_s24 + $0x18] sm:$0xff] }
  0x62   : > { %4880 = vmatprep.subr.mxu1 %v1196_v16  ;;  %4895 = vmatprep.subr.mxu0 %v1214_v17  ;;  %v1641_v11 = vld [vmem:[%s5708_s24 + $0x20] sm:$0xff]  ;;  %v1656_v13 = vld [vmem:[%s5713_s30 + $0x18] sm:$0xff]  ;;  %v1639_v14 = vld [vmem:[%s5708_s24 + $0x10] sm:$0xff] }
  0x63   : > { %4881 = vmatpush3.msra.mxu1 %v1196_v16  ;;  %4896 = vmatpush3.msra.mxu0 %v1214_v17  ;;  %v1655_v15 = vld [vmem:[%s5713_s30 + $0x10] sm:$0xff]  ;;  %v1638_v16 = vld [vmem:[%s5708_s24 + $0x8] sm:$0xff] }
  0x64   : > { %4882 = vmatprep.subr.mxu1 %v1195_v18  ;;  %4897 = vmatprep.subr.mxu0 %v1213_v19  ;;  %v1654_v17 = vld [vmem:[%s5713_s30 + $0x8] sm:$0xff] }
  0x65   : > { %4883 = vmatpush3.msra.mxu1 %v1195_v18  ;;  %4898 = vmatpush3.msra.mxu0 %v1213_v19  ;;  %v1637_v18 = vld [vmem:[%s5708_s24] sm:$0xff] }
  0x66   : > { %4884 = vmatprep.subr.mxu1 %v1194_v20  ;;  %4899 = vmatprep.subr.mxu0 %v1212_v21  ;;  %v1653_v19 = vld [vmem:[%s5713_s30] sm:$0xff] }
  0x67   : > { %4885 = vmatpush3.msra.mxu1 %v1194_v20  ;;  %4900 = vmatpush3.msra.mxu0 %v1212_v21 }
  0x68   : > { %4886 = vmatprep.subr.mxu1 %v1193_v22  ;;  %4901 = vmatprep.subr.mxu0 %v1211_v23 }
  0x69   : > { %4887 = vmatpush3.msra.mxu1 %v1193_v22  ;;  %4902 = vmatpush3.msra.mxu0 %v1211_v23 }
  0x6a   : > { %4888 = vmatprep.subr.mxu1 %v1192_v24  ;;  %4903 = vmatprep.subr.mxu0 %v1210_v25 }
  0x6b   : > { %4889 = vmatpush3.msra.mxu1 %v1192_v24  ;;  %4904 = vmatpush3.msra.mxu0 %v1210_v25  ;;  %v1972_v24 = vld [vmem:[%s5723_s12 + $0x38] sm:$0xff] }
  0x6c   : > { %4890 = vmatprep.subr.mxu1 %v1191_v26  ;;  %4905 = vmatprep.subr.mxu0 %v1209_v27 }
  0x6d   : > { %4891 = vmatpush3.msra.mxu1 %v1191_v26  ;;  %4906 = vmatpush3.msra.mxu0 %v1209_v27  ;;  %v1971_v26 = vld [vmem:[%s5723_s12 + $0x30] sm:$0xff]  ;;  %v1970_v27 = vld [vmem:[%s5723_s12 + $0x28] sm:$0xff] }
  0x6e   : > { %4907 = vmatprep.subr.mxu0 %v1208_v28  ;;  %4914 = vmatprep.subr.mxu1 %v5643_v34 }
  0x6f   : > { %4908 = vmatpush3.msra.mxu0 %v1208_v28  ;;  %v1969_v28 = vld [vmem:[%s5723_s12 + $0x20] sm:$0xff] }
  0x70   : > { %4909 = vmatprep.subr.mxu0 %v1207_v29 }
  0x71   : > { %4910 = vmatpush3.msra.mxu0 %v1207_v29  ;;  %v1968_v29 = vld [vmem:[%s5723_s12 + $0x18] sm:$0xff] }
  0x72   : > { %4963 = vmatprep.subr.mxu0 %v5643_v34 }
 0x117   : > { %v5902_v30 = vpop.f32.mrf.mxu1 }
 0x119   : > { %v5904_v31 = vpop.f32.mrf.mxu1 }
 0x11a   : > { %4892 = vmatprep.mubr.msk.f32.mxu1 %vm1378_vm1, %v5904_v31 }
 0x11b   : > { %4893 = vmatmul.mubr.msk.f32.vlgmr.msra.gmra.mxu1 %vm1378_vm1, %v5902_v30 }
 0x11c   : > { %v5908_v32 = vpop.f32.mrf.mxu1  ;;  %4918 = vmatprep.mubr.msk.f32.mxu1 %vm5644_vm2, %v5643_v34 }
 0x11e   : > { %v5912_v33 = vpop.f32.mrf.mxu1 }
 0x11f   : > { %4911 = vmatprep.mubr.msk.f32.mxu0 %vm1378_vm1, %v5912_v33 }
 0x120   : > { %4912 = vmatmul.mubr.msk.f32.vlgmr.msra.gmra.mxu0 %vm1378_vm1, %v5908_v32 }
 0x121   : > { %4995 = vmatprep.mubr.msk.f32.mxu0 %vm5644_vm2, %v5643_v34  ;;  %4964 = vmatpush3.msra.mxu0 %v1668_v35  ;;  %v4875_v47 = vpop.f32.mrf.mxu0  ;;  %v1967_v35 = vld [vmem:[%s5723_s12 + $0x10] sm:$0xff] }
 0x122   : > { %4965 = vmatprep.subr.mxu0 %v5643_v34 }
 0x123   : > { %4966 = vmatpush3.msra.mxu0 %v1667_v36  ;;  %v1451_v49 = vpop.f32.mrf.mxu0  ;;  %v1966_v36 = vld [vmem:[%s5723_s12 + $0x8] sm:$0xff] }
 0x124   : > { %4967 = vmatprep.subr.mxu0 %v5643_v34 }
 0x125   : > { %4968 = vmatpush3.msra.mxu0 %v1666_v37  ;;  %v1965_v37 = vld [vmem:[%s5723_s12] sm:$0xff] }
 0x126   : > { %4969 = vmatprep.subr.mxu0 %v5643_v34 }
 0x127   : > { %4970 = vmatpush3.msra.mxu0 %v1665_v38 }
 0x128   : > { %4971 = vmatprep.subr.mxu0 %v5643_v34 }
 0x129   : > { %4972 = vmatpush3.msra.mxu0 %v1664_v39 }
 0x12a   : > { %4973 = vmatprep.subr.mxu0 %v5643_v34 }
 0x12b   : > { %4974 = vmatpush3.msra.mxu0 %v1663_v40 }
 0x12c   : > { %4975 = vmatprep.subr.mxu0 %v5643_v34 }
 0x12d   : > { %4976 = vmatpush3.msra.mxu0 %v1662_v41  ;;  %v6024_v41 = vld [vmem:[%s5668_s17] sm:$0xff] }
 0x12e   : > { %4977 = vmatprep.subr.mxu0 %v5643_v34 }
 0x12f   : > { %4978 = vmatpush3.msra.mxu0 %v1661_v42 }
 0x130   : > { %4979 = vmatprep.subr.mxu0 %v5643_v34 }
 0x131   : > { %4980 = vmatpush3.msra.mxu0 %v1660_v43 }
 0x132   : > { %4981 = vmatprep.subr.mxu0 %v5643_v34 }
 0x133   : > { %4982 = vmatpush3.msra.mxu0 %v1659_v44  ;;  %v1980_v44 = vld [vmem:[%s5728_s20 + $0x38] sm:$0xff] }
 0x134   : > { %4983 = vmatprep.subr.mxu0 %v5643_v34 }
 0x135   : > { %4984 = vmatpush3.msra.mxu0 %v1658_v45  ;;  %v6037_v45 = vld [vmem:[%s6534_s28] sm:$0xff]  ;;  %s6543_s28 = sld [smem:[#allocation13_spill]] }
 0x136   : > { %4985 = vmatprep.subr.mxu0 %v5643_v34 }
 0x137   : > { %4986 = vmatpush3.msra.mxu0 %v1657_v46  ;;  %v1979_v46 = vld [vmem:[%s5728_s20 + $0x30] sm:$0xff] }
 0x138   : > { %4987 = vmatprep.subr.mxu0 %v5643_v34 }
 0x139   : > { %4988 = vmatpush3.msra.mxu0 %v1656_v13  ;;  %v2380_v13 = vld [vmem:[%s6536_s2 + $0x28] sm:$0xff] }
 0x13a   : > { %4989 = vmatprep.subr.mxu0 %v5643_v34 }
 0x13b   : > { %4990 = vmatpush3.msra.mxu0 %v1655_v15 }
 0x13c   : > { %4991 = vmatprep.subr.mxu0 %v5643_v34 }
 0x13d   : > { %4992 = vmatpush3.msra.mxu0 %v1654_v17 }
 0x13e   : > { %4993 = vmatprep.subr.mxu0 %v5643_v34 }
 0x13f   : > { %4994 = vmatpush3.msra.mxu0 %v1653_v19  ;;  %v4467_v19 = vld [vmem:[%s6537_s7] ss:$0 sm:$0xff]  ;;  %s6544_s7 = sld [smem:[#allocation12_spill]] }
 0x140   : > { %5008 = vmatprep.subr.mxu0 %v5643_v34 }
 0x1db   : > { %v4894_v48 = vpop.f32.mrf.mxu1 }
 0x1dc   : > { %v1538_v51 = vadd.f32 %v4894_v48, %v4875_v47  ;;  %v1964_v47 = vld [vmem:[%s6535_s1 + $0x38] sm:$0xff]  ;;  %v1978_v48 = vld [vmem:[%s5728_s20 + $0x28] sm:$0xff] }
 0x1dd   : > { %v1532_v50 = vpop.f32.mrf.mxu1 }
 0x1de   : > { %v1533_v54 = vadd.f32 %v1532_v50, %v1451_v49  ;;  %v1963_v49 = vld [vmem:[%s6535_s1 + $0x30] sm:$0xff]  ;;  %v1977_v50 = vld [vmem:[%s5728_s20 + $0x20] sm:$0xff] }
 0x1e0   : > { %v4913_v52 = vpop.f32.mrf.mxu0 }
 0x1e1   : > { %v1623_v55 = vadd.f32 %v4913_v52, %v1538_v51  ;;  %v1962_v51 = vld [vmem:[%s6535_s1 + $0x28] sm:$0xff]  ;;  %v1976_v52 = vld [vmem:[%s5728_s20 + $0x18] sm:$0xff] }
 0x1e2   : > { %v1613_v56 = vpop.f32.mrf.mxu0 }
 0x1e3   : > { %v1632_v57 = vadd.f32 %v4459_v53, %v1623_v55  ;;  %v1622_v58 = vadd.f32 %v1613_v56, %v1533_v54  ;;  %v1960_v54 = vld [vmem:[%s6535_s1 + $0x18] sm:$0xff]  ;;  %v1959_v55 = vld [vmem:[%s6535_s1 + $0x10] sm:$0xff]  ;;  %v1958_v56 = vld [vmem:[%s6535_s1 + $0x8] sm:$0xff] }
 0x1e5   : > { %v1634_v59 = vmax.f32 %v1632_v57, 0.0  ;;  %v1631_v60 = vadd.f32 %v4459_v53, %v1622_v58  ;;  %v1961_v53 = vld [vmem:[%s6535_s1 + $0x20] sm:$0xff]  ;;  %v1975_v58 = vld [vmem:[%s5728_s20 + $0x10] sm:$0xff] }
 0x1e6   : > { %v1957_v57 = vld [vmem:[%s6535_s1] sm:$0xff]  ;;  %s6549_s1 = sld [smem:[#allocation19_spill]] }
 0x1e7   : > { %v1633_v61 = vmax.f32 %v1631_v60, 0.0  ;;  %4915 = vmatpush3.msra.mxu1 %v1634_v59  ;;  %v1973_v60 = vld [vmem:[%s5728_s20] sm:$0xff] }
 0x1e8   : > { %4916 = vmatprep.subr.mxu1 %v5643_v34 }
 0x1e9   : > { %4917 = vmatpush3.msra.mxu1 %v1633_v61 }
 0x1ea   : > { %4919 = vmatmul.mubr.msk.f32.vlgmr.msra.gmra.mxu1 %vm1215_vm0, %v1635_v62  ;;  %4921 = vmatprep.subr.mxu1 %v5643_v34 }
 0x1eb   : > { %4922 = vmatpush3.msra.mxu1 %v1634_v59  ;;  %4925 = vmatprep.mubr.msk.f32.mxu1 %vm5644_vm2, %v5643_v34  ;;  %v1974_v59 = vld [vmem:[%s5728_s20 + $0x8] sm:$0xff] }
 0x1ec   : > { %4923 = vmatprep.subr.mxu1 %v5643_v34 }
 0x1ed   : > { %4924 = vmatpush3.msra.mxu1 %v1633_v61 }
 0x1ee   : > { %4926 = vmatmul.mubr.msk.f32.vlgmr.msra.gmra.mxu1 %vm1215_vm0, %v1636_v63  ;;  %4928 = vmatprep.subr.mxu1 %v5643_v34 }
 0x1ef   : > { %4929 = vmatpush3.msra.mxu1 %v1652_v0  ;;  %4960 = vmatprep.mubr.msk.f32.mxu1 %vm5644_vm2, %v5643_v34 }
 0x1f0   : > { %4930 = vmatprep.subr.mxu1 %v5643_v34 }
 0x1f1   : > { %4931 = vmatpush3.msra.mxu1 %v1651_v1 }
 0x1f2   : > { %4932 = vmatprep.subr.mxu1 %v5643_v34 }
 0x1f3   : > { %4933 = vmatpush3.msra.mxu1 %v1650_v2 }
 0x1f4   : > { %4934 = vmatprep.subr.mxu1 %v5643_v34 }
 0x1f5   : > { %4935 = vmatpush3.msra.mxu1 %v1649_v3  ;;  %v2390_v3 = vld [vmem:[%s6536_s2 + $0x78] sm:$0xff] }
 0x1f6   : > { %4936 = vmatprep.subr.mxu1 %v5643_v34 }
 0x1f7   : > { %4937 = vmatpush3.msra.mxu1 %v1648_v4  ;;  %v2389_v4 = vld [vmem:[%s6536_s2 + $0x70] sm:$0xff] }
 0x1f8   : > { %4938 = vmatprep.subr.mxu1 %v5643_v34 }
 0x1f9   : > { %4939 = vmatpush3.msra.mxu1 %v1647_v5  ;;  %v2388_v5 = vld [vmem:[%s6536_s2 + $0x68] sm:$0xff] }
 0x1fa   : > { %4940 = vmatprep.subr.mxu1 %v5643_v34 }
 0x1fb   : > { %4941 = vmatpush3.msra.mxu1 %v1646_v6  ;;  %v2387_v6 = vld [vmem:[%s6536_s2 + $0x60] sm:$0xff] }
 0x1fc   : > { %4942 = vmatprep.subr.mxu1 %v5643_v34 }
 0x1fd   : > { %4943 = vmatpush3.msra.mxu1 %v1645_v7  ;;  %v2386_v7 = vld [vmem:[%s6536_s2 + $0x58] sm:$0xff] }
 0x1fe   : > { %4944 = vmatprep.subr.mxu1 %v5643_v34 }
 0x1ff   : > { %4945 = vmatpush3.msra.mxu1 %v1644_v8  ;;  %v2385_v8 = vld [vmem:[%s6536_s2 + $0x50] sm:$0xff] }
 0x200   : > { %4946 = vmatprep.subr.mxu1 %v5643_v34 }
 0x201   : > { %4947 = vmatpush3.msra.mxu1 %v1643_v9  ;;  %v2384_v9 = vld [vmem:[%s6536_s2 + $0x48] sm:$0xff] }
 0x202   : > { %4948 = vmatprep.subr.mxu1 %v5643_v34 }
 0x203   : > { %4949 = vmatpush3.msra.mxu1 %v1642_v10  ;;  %v2383_v10 = vld [vmem:[%s6536_s2 + $0x40] sm:$0xff] }
 0x204   : > { %4950 = vmatprep.subr.mxu1 %v5643_v34 }
 0x205   : > { %4951 = vmatpush3.msra.mxu1 %v1641_v11  ;;  %v2382_v11 = vld [vmem:[%s6536_s2 + $0x38] sm:$0xff] }
 0x206   : > { %4952 = vmatprep.subr.mxu1 %v5643_v34 }
 0x207   : > { %4953 = vmatpush3.msra.mxu1 %v1640_v12  ;;  %v2381_v12 = vld [vmem:[%s6536_s2 + $0x30] sm:$0xff] }
 0x208   : > { %4954 = vmatprep.subr.mxu1 %v5643_v34 }
 0x209   : > { %4955 = vmatpush3.msra.mxu1 %v1639_v14  ;;  %v2379_v14 = vld [vmem:[%s6536_s2 + $0x20] sm:$0xff] }
 0x20a   : > { %4956 = vmatprep.subr.mxu1 %v5643_v34 }
 0x20b   : > { %4957 = vmatpush3.msra.mxu1 %v1638_v16 }
 0x20c   : > { %4958 = vmatprep.subr.mxu1 %v5643_v34 }
 0x20d   : > { %4959 = vmatpush3.msra.mxu1 %v1637_v18 }
 0x20e   : > { %4998 = vmatprep.subr.mxu1 %v5643_v34 }
 0x2aa   : > { %v1738_v20 = vpop.f32.mrf.mxu1 }
 0x2ac   : > { %v4920_v21 = vpop.f32.mrf.mxu1 }
 0x2ae   : > { %v1811_v22 = vpop.f32.mrf.mxu1 }
 0x2af   : > { %v1815_v23 = vmax.f32 %v1738_v20, %v1811_v22 }
 0x2b0   : > { %v4927_v25 = vpop.f32.mrf.mxu1 }
 0x2b1   : > { %4961 = vmatmul.mubr.f32.vlgmr.msra.gmra.mxu1 %v1815_v23  ;;  %4996 = vmatmul.mubr.f32.vlgmr.msra.gmra.mxu0 %v1815_v23  ;;  %v2358_v25 = vld [vmem:[%s6539_s11] sm:$0xf]  ;;  %s6546_s11 = sld [smem:[#allocation16_spill]] }
 0x2b2   : > { %5009 = vmatpush3.msra.mxu0 %v1972_v24  ;;  %5024 = vmatprep.mubr.msk.f32.mxu0 %vm5644_vm2, %v5643_v34  ;;  %v2357_v24 = vld [vmem:[%s6538_s10] sm:$0xf]  ;;  %s6545_s10 = sld [smem:[#allocation14_spill]] }
 0x2b3   : > { %5010 = vmatprep.subr.mxu0 %v5643_v34  ;;  %5000 = vmatprep.mubr.msk.f32.mxu1 %vm5644_vm2, %v5643_v34 }
 0x2b4   : > { %5011 = vmatpush3.msra.mxu0 %v1971_v26  ;;  %v2374_v26 = vld [vmem:[%s6540_s15 + $0x78] sm:$0xff] }
 0x2b5   : > { %5012 = vmatprep.subr.mxu0 %v5643_v34 }
 0x2b6   : > { %5013 = vmatpush3.msra.mxu0 %v1970_v27  ;;  %v2373_v27 = vld [vmem:[%s6540_s15 + $0x70] sm:$0xff] }
 0x2b7   : > { %5014 = vmatprep.subr.mxu0 %v5643_v34 }
 0x2b8   : > { %5015 = vmatpush3.msra.mxu0 %v1969_v28  ;;  %v2372_v28 = vld [vmem:[%s6540_s15 + $0x68] sm:$0xff] }
 0x2b9   : > { %5016 = vmatprep.subr.mxu0 %v5643_v34 }
 0x2ba   : > { %5017 = vmatpush3.msra.mxu0 %v1968_v29  ;;  %v2371_v29 = vld [vmem:[%s6540_s15 + $0x60] sm:$0xff] }
 0x2bb   : > { %5018 = vmatprep.subr.mxu0 %v5643_v34 }
 0x2bc   : > { %5019 = vmatpush3.msra.mxu0 %v1967_v35  ;;  %v2370_v35 = vld [vmem:[%s6540_s15 + $0x58] sm:$0xff] }
 0x2bd   : > { %5020 = vmatprep.subr.mxu0 %v5643_v34 }
 0x2be   : > { %5021 = vmatpush3.msra.mxu0 %v1966_v36  ;;  %v2369_v36 = vld [vmem:[%s6540_s15 + $0x50] sm:$0xff] }
 0x2bf   : > { %5022 = vmatprep.subr.mxu0 %v5643_v34 }
 0x2c0   : > { %5023 = vmatpush3.msra.mxu0 %v1965_v37  ;;  %v2368_v37 = vld [vmem:[%s6540_s15 + $0x48] sm:$0xff] }
 0x2c1   : > { %5046 = vmatprep.subr.mxu0 %v5643_v34 }
 0x371   : > { %v1882_v38 = vpop.f32.mrf.mxu1  ;;  %v1952_v39 = vpop.f32.mrf.mxu0 }
 0x372   : > { %v6021_v40 = vmax.f32 %v1882_v38, %v1952_v39  ;;  %v2367_v38 = vld [vmem:[%s6540_s15 + $0x40] sm:$0xff]  ;;  %v2366_v39 = vld [vmem:[%s6540_s15 + $0x38] sm:$0xff] }
 0x373   : > { %v4962_v42 = vpop.f32.mrf.mxu1  ;;  %v4997_v43 = vpop.f32.mrf.mxu0 }
 0x374   : > { %4999 = vmatpush3.msra.mxu1 %v6021_v40  ;;  %5025 = vmatmul.mubr.msk.f32.vlgmr.msra.gmra.mxu0 %vm1378_vm1, %v6021_v40  ;;  %v2365_v42 = vld [vmem:[%s6540_s15 + $0x30] sm:$0xff]  ;;  %v2364_v43 = vld [vmem:[%s6540_s15 + $0x28] sm:$0xff] }
 0x375   : > { %5001 = vmatmul.mubr.msk.f32.vlgmr.msra.gmra.mxu1 %vm1981_vm3, %v6024_v41  ;;  %5003 = vmatprep.subr.mxu1 %v5643_v34 }
 0x376   : > { %5004 = vmatpush3.msra.mxu1 %v6021_v40  ;;  %5005 = vmatprep.mubr.msk.f32.mxu1 %vm5644_vm2, %v5643_v34 }
 0x377   : > { %5027 = vmatprep.subr.mxu1 %v5643_v34  ;;  %5047 = vmatpush3.msra.mxu0 %v1980_v44  ;;  %v2363_v44 = vld [vmem:[%s6540_s15 + $0x20] sm:$0xff] }
 0x378   : > { %5048 = vmatprep.subr.mxu0 %v5643_v34  ;;  %5062 = vmatprep.mubr.msk.f32.mxu0 %vm5644_vm2, %v5643_v34 }
 0x379   : > { %5006 = vmatmul.mubr.msk.f32.vlgmr.msra.gmra.mxu1 %vm1981_vm3, %v6037_v45  ;;  %5049 = vmatpush3.msra.mxu0 %v1979_v46  ;;  %v2362_v46 = vld [vmem:[%s6540_s15 + $0x18] sm:$0xff] }
 0x37a   : > { %5028 = vmatpush3.msra.mxu1 %v1964_v47  ;;  %5050 = vmatprep.subr.mxu0 %v5643_v34  ;;  %v2378_v47 = vld [vmem:[%s6536_s2 + $0x18] sm:$0xff] }
 0x37b   : > { %5029 = vmatprep.subr.mxu1 %v5643_v34  ;;  %5051 = vmatpush3.msra.mxu0 %v1978_v48  ;;  %v2361_v48 = vld [vmem:[%s6540_s15 + $0x10] sm:$0xff] }
 0x37c   : > { %5030 = vmatpush3.msra.mxu1 %v1963_v49  ;;  %5052 = vmatprep.subr.mxu0 %v5643_v34  ;;  %v2377_v49 = vld [vmem:[%s6536_s2 + $0x10] sm:$0xff] }
 0x37d   : > { %5031 = vmatprep.subr.mxu1 %v5643_v34  ;;  %5053 = vmatpush3.msra.mxu0 %v1977_v50  ;;  %v2360_v50 = vld [vmem:[%s6540_s15 + $0x8] sm:$0xff] }
 0x37e   : > { %5032 = vmatpush3.msra.mxu1 %v1962_v51  ;;  %5054 = vmatprep.subr.mxu0 %v5643_v34  ;;  %v2376_v51 = vld [vmem:[%s6536_s2 + $0x8] sm:$0xff] }
 0x37f   : > { %5033 = vmatprep.subr.mxu1 %v5643_v34  ;;  %5055 = vmatpush3.msra.mxu0 %v1976_v52  ;;  %v2359_v52 = vld [vmem:[%s6540_s15] sm:$0xff] }
 0x380   : > { %5034 = vmatpush3.msra.mxu1 %v1961_v53  ;;  %5056 = vmatprep.subr.mxu0 %v5643_v34  ;;  %v2375_v53 = vld [vmem:[%s6536_s2] sm:$0xff]  ;;  %s6550_s2 = sld [smem:[#allocation18_spill]] }
 0x381   : > { %5035 = vmatprep.subr.mxu1 %v5643_v34  ;;  %5043 = vmatprep.mubr.msk.f32.mxu1 %vm5644_vm2, %v5643_v34 }
 0x382   : > { %5036 = vmatpush3.msra.mxu1 %v1960_v54  ;;  %5057 = vmatpush3.msra.mxu0 %v1975_v58 }
 0x383   : > { %5037 = vmatprep.subr.mxu1 %v5643_v34  ;;  %5058 = vmatprep.subr.mxu0 %v5643_v34 }
 0x384   : > { %5038 = vmatpush3.msra.mxu1 %v1959_v55  ;;  %5059 = vmatpush3.msra.mxu0 %v1974_v59 }
 0x385   : > { %5039 = vmatprep.subr.mxu1 %v5643_v34  ;;  %5060 = vmatprep.subr.mxu0 %v5643_v34 }
 0x386   : > { %5040 = vmatpush3.msra.mxu1 %v1958_v56  ;;  %5061 = vmatpush3.msra.mxu0 %v1973_v60 }
 0x387   : > { %5041 = vmatprep.subr.mxu1 %v5643_v34  ;;  %5110 = vmatprep.subr.mxu0 %v5643_v34 }
 0x388   : > { %5042 = vmatpush3.msra.mxu1 %v1957_v57 }
 0x389   : > { %5065 = vmatprep.subr.mxu1 %v5643_v34 }
 0x434   : > { %v2197_v61 = vpop.f32.mrf.mxu0 }
 0x435   : > { %v6077_v62 = vpop.f32.mrf.mxu1 }
 0x436   : > { %v5026_v63 = vpop.f32.mrf.mxu0  ;;  %5044 = vmatmul.mubr.msk.f32.vlgmr.msra.gmra.mxu1 %vm1378_vm1, %v6077_v62 }
 0x437   : > { %v5002_v0 = vpop.f32.mrf.mxu1  ;;  %5067 = vmatprep.mubr.msk.f32.mxu1 %vm5644_vm2, %v5643_v34  ;;  %v2679_v63 = vld [vmem:[%s6541_s16] sm:$0xff]  ;;  %s6547_s16 = sld [smem:[#allocation17_spill]] }
 0x439   : > { %v6083_v1 = vpop.f32.mrf.mxu1 }
 0x43a   : > { %5063 = vmatmul.mubr.msk.f32.vlgmr.msra.gmra.mxu0 %vm1378_vm1, %v6083_v1 }
 0x43b   : > { %v5007_v2 = vpop.f32.mrf.mxu1  ;;  %5142 = vmatprep.mubr.msk.f32.mxu0 %vm5644_vm2, %v5643_v34  ;;  %5111 = vmatpush3.msra.mxu0 %v2390_v3  ;;  %v2687_v3 = vld [vmem:[%s6542_s18 + $0x38] sm:$0xff] }
 0x43c   : > { %5112 = vmatprep.subr.mxu0 %v5643_v34 }
 0x43d   : > { %5113 = vmatpush3.msra.mxu0 %v2389_v4  ;;  %v2686_v4 = vld [vmem:[%s6542_s18 + $0x30] sm:$0xff] }
 0x43e   : > { %5114 = vmatprep.subr.mxu0 %v5643_v34 }
 0x43f   : > { %5115 = vmatpush3.msra.mxu0 %v2388_v5  ;;  %v2685_v5 = vld [vmem:[%s6542_s18 + $0x28] sm:$0xff] }
 0x440   : > { %5116 = vmatprep.subr.mxu0 %v5643_v34 }
 0x441   : > { %5117 = vmatpush3.msra.mxu0 %v2387_v6  ;;  %v2684_v6 = vld [vmem:[%s6542_s18 + $0x20] sm:$0xff] }
 0x442   : > { %5118 = vmatprep.subr.mxu0 %v5643_v34 }
 0x443   : > { %5119 = vmatpush3.msra.mxu0 %v2386_v7  ;;  %v2683_v7 = vld [vmem:[%s6542_s18 + $0x18] sm:$0xff] }
 0x444   : > { %5120 = vmatprep.subr.mxu0 %v5643_v34 }
 0x445   : > { %5121 = vmatpush3.msra.mxu0 %v2385_v8  ;;  %v2682_v8 = vld [vmem:[%s6542_s18 + $0x10] sm:$0xff] }
 0x446   : > { %5122 = vmatprep.subr.mxu0 %v5643_v34 }
 0x447   : > { %5123 = vmatpush3.msra.mxu0 %v2384_v9  ;;  %v2681_v9 = vld [vmem:[%s6542_s18 + $0x8] sm:$0xff] }
 0x448   : > { %5124 = vmatprep.subr.mxu0 %v5643_v34 }
 0x449   : > { %5125 = vmatpush3.msra.mxu0 %v2383_v10  ;;  %v2680_v10 = vld [vmem:[%s6542_s18] sm:$0xff] }
 0x44a   : > { %5126 = vmatprep.subr.mxu0 %v5643_v34 }
 0x44b   : > { %5127 = vmatpush3.msra.mxu0 %v2382_v11 }
 0x44c   : > { %5128 = vmatprep.subr.mxu0 %v5643_v34 }
 0x44d   : > { %5129 = vmatpush3.msra.mxu0 %v2381_v12 }
 0x44e   : > { %5130 = vmatprep.subr.mxu0 %v5643_v34 }
 0x44f   : > { %5131 = vmatpush3.msra.mxu0 %v2380_v13 }
 0x450   : > { %5132 = vmatprep.subr.mxu0 %v5643_v34 }
 0x451   : > { %5133 = vmatpush3.msra.mxu0 %v2379_v14  ;;  %v2870_v14 = vld [vmem:[%s6543_s28 + $0x78] sm:$0xff] }
 0x452   : > { %5134 = vmatprep.subr.mxu0 %v5643_v34 }
 0x453   : > { %5135 = vmatpush3.msra.mxu0 %v2378_v47  ;;  %v2857_v47 = vld [vmem:[%s6543_s28 + $0x10] sm:$0xff] }
 0x454   : > { %5136 = vmatprep.subr.mxu0 %v5643_v34 }
 0x455   : > { %5137 = vmatpush3.msra.mxu0 %v2377_v49  ;;  %v2856_v49 = vld [vmem:[%s6543_s28 + $0x8] sm:$0xff] }
 0x456   : > { %5138 = vmatprep.subr.mxu0 %v5643_v34 }
 0x457   : > { %5139 = vmatpush3.msra.mxu0 %v2376_v51  ;;  %v2855_v51 = vld [vmem:[%s6543_s28] sm:$0xff] }
 0x458   : > { %5140 = vmatprep.subr.mxu0 %v5643_v34 }
 0x459   : > { %5141 = vmatpush3.msra.mxu0 %v2375_v53  ;;  %v2839_v53 = vld [vmem:[%s6544_s7] sm:$0xff] }
 0x45a   : > { %5174 = vmatprep.subr.mxu0 %v5643_v34 }
 0x4f6   : > { %v2270_v15 = vpop.f32.mrf.mxu1 }
 0x4f7   : > { %v2271_v17 = vadd.f32 %v2270_v15, %v2197_v61 }
 0x4f8   : > { %v5045_v16 = vpop.f32.mrf.mxu1 }
 0x4f9   : > { %v2854_v16 = vld [vmem:[%s6544_s7 + $0x78] sm:$0xff] }
 0x4fa   : > { %v2343_v18 = vpop.f32.mrf.mxu0 }
 0x4fb   : > { %v2347_v20 = vadd.f32 %v2343_v18, %v2271_v17  ;;  %v2869_v17 = vld [vmem:[%s6543_s28 + $0x70] sm:$0xff] }
 0x4fc   : > { %v5064_v21 = vpop.f32.mrf.mxu0  ;;  %v2853_v18 = vld [vmem:[%s6544_s7 + $0x70] sm:$0xff] }
 0x4fd   : > { %v2355_v22 = vadd.f32 %v4467_v19, %v2347_v20  ;;  %v2867_v19 = vld [vmem:[%s6543_s28 + $0x60] sm:$0xff]  ;;  %v2866_v21 = vld [vmem:[%s6543_s28 + $0x58] sm:$0xff] }
 0x4fe   : > { %v2851_v20 = vld [vmem:[%s6544_s7 + $0x60] sm:$0xff] }
 0x4ff   : > { %v2356_v23 = vmax.f32 %v2355_v22, 0.0  ;;  %v2850_v22 = vld [vmem:[%s6544_s7 + $0x58] sm:$0xff] }
 0x501   : > { %5066 = vmatpush3.msra.mxu1 %v2356_v23 }
 0x502   : > { %5068 = vmatmul.mubr.msk.f32.vlgmr.msra.gmra.mxu1 %vm1981_vm3, %v2357_v24  ;;  %5070 = vmatprep.subr.mxu1 %v5643_v34  ;;  %v2849_v24 = vld [vmem:[%s6544_s7 + $0x50] sm:$0xff] }
 0x503   : > { %5071 = vmatpush3.msra.mxu1 %v2356_v23  ;;  %5072 = vmatprep.mubr.msk.f32.mxu1 %vm5644_vm2, %v5643_v34  ;;  %v2865_v23 = vld [vmem:[%s6543_s28 + $0x50] sm:$0xff] }
 0x504   : > { %5075 = vmatprep.subr.mxu1 %v5643_v34 }
 0x506   : > { %5073 = vmatmul.mubr.msk.f32.vlgmr.msra.gmra.mxu1 %vm1981_vm3, %v2358_v25  ;;  %v2864_v25 = vld [vmem:[%s6543_s28 + $0x48] sm:$0xff] }
 0x507   : > { %5076 = vmatpush3.msra.mxu1 %v2374_v26  ;;  %5107 = vmatprep.mubr.msk.f32.mxu1 %vm5644_vm2, %v5643_v34  ;;  %v2848_v26 = vld [vmem:[%s6544_s7 + $0x48] sm:$0xff] }
 0x508   : > { %5077 = vmatprep.subr.mxu1 %v5643_v34 }
 0x509   : > { %5078 = vmatpush3.msra.mxu1 %v2373_v27  ;;  %v2863_v27 = vld [vmem:[%s6543_s28 + $0x40] sm:$0xff] }
 0x50a   : > { %5079 = vmatprep.subr.mxu1 %v5643_v34 }
 0x50b   : > { %5080 = vmatpush3.msra.mxu1 %v2372_v28  ;;  %v2847_v28 = vld [vmem:[%s6544_s7 + $0x40] sm:$0xff] }
 0x50c   : > { %5081 = vmatprep.subr.mxu1 %v5643_v34 }
 0x50d   : > { %5082 = vmatpush3.msra.mxu1 %v2371_v29  ;;  %v2862_v29 = vld [vmem:[%s6543_s28 + $0x38] sm:$0xff] }
 0x50e   : > { %5083 = vmatprep.subr.mxu1 %v5643_v34 }
 0x50f   : > { %5084 = vmatpush3.msra.mxu1 %v2370_v35  ;;  %v2846_v35 = vld [vmem:[%s6544_s7 + $0x38] sm:$0xff] }
 0x510   : > { %5085 = vmatprep.subr.mxu1 %v5643_v34 }
 0x511   : > { %5086 = vmatpush3.msra.mxu1 %v2369_v36  ;;  %v2861_v36 = vld [vmem:[%s6543_s28 + $0x30] sm:$0xff] }
 0x512   : > { %5087 = vmatprep.subr.mxu1 %v5643_v34 }
 0x513   : > { %5088 = vmatpush3.msra.mxu1 %v2368_v37  ;;  %v2845_v37 = vld [vmem:[%s6544_s7 + $0x30] sm:$0xff] }
 0x514   : > { %5089 = vmatprep.subr.mxu1 %v5643_v34 }
 0x515   : > { %5090 = vmatpush3.msra.mxu1 %v2367_v38  ;;  %v2860_v38 = vld [vmem:[%s6543_s28 + $0x28] sm:$0xff] }
 0x516   : > { %5091 = vmatprep.subr.mxu1 %v5643_v34 }
 0x517   : > { %5092 = vmatpush3.msra.mxu1 %v2366_v39  ;;  %v2844_v39 = vld [vmem:[%s6544_s7 + $0x28] sm:$0xff] }
 0x518   : > { %5093 = vmatprep.subr.mxu1 %v5643_v34 }
 0x519   : > { %5094 = vmatpush3.msra.mxu1 %v2365_v42  ;;  %v2859_v42 = vld [vmem:[%s6543_s28 + $0x20] sm:$0xff] }
 0x51a   : > { %5095 = vmatprep.subr.mxu1 %v5643_v34 }
 0x51b   : > { %5096 = vmatpush3.msra.mxu1 %v2364_v43  ;;  %v2843_v43 = vld [vmem:[%s6544_s7 + $0x20] sm:$0xff] }
 0x51c   : > { %5097 = vmatprep.subr.mxu1 %v5643_v34 }
 0x51d   : > { %5098 = vmatpush3.msra.mxu1 %v2363_v44  ;;  %v2858_v44 = vld [vmem:[%s6543_s28 + $0x18] sm:$0xff] }
 0x51e   : > { %5099 = vmatprep.subr.mxu1 %v5643_v34 }
 0x51f   : > { %5100 = vmatpush3.msra.mxu1 %v2362_v46  ;;  %v2842_v46 = vld [vmem:[%s6544_s7 + $0x18] sm:$0xff] }
 0x520   : > { %5101 = vmatprep.subr.mxu1 %v5643_v34 }
 0x521   : > { %5102 = vmatpush3.msra.mxu1 %v2361_v48  ;;  %v2841_v48 = vld [vmem:[%s6544_s7 + $0x10] sm:$0xff] }
 0x522   : > { %5103 = vmatprep.subr.mxu1 %v5643_v34 }
 0x523   : > { %5104 = vmatpush3.msra.mxu1 %v2360_v50  ;;  %v2840_v50 = vld [vmem:[%s6544_s7 + $0x8] sm:$0xff] }
 0x524   : > { %5105 = vmatprep.subr.mxu1 %v5643_v34 }
 0x525   : > { %5106 = vmatpush3.msra.mxu1 %v2359_v52  ;;  %v2886_v52 = vld [vmem:[%s6545_s10 + $0x78] sm:$0xff] }
 0x526   : > { %5145 = vmatprep.subr.mxu1 %v5643_v34 }
 0x5c2   : > { %v2460_v54 = vpop.f32.mrf.mxu1 }
 0x5c4   : > { %v5069_v55 = vpop.f32.mrf.mxu1 }
 0x5c5   : > { %v2884_v55 = vld [vmem:[%s6545_s10 + $0x68] sm:$0xff] }
 0x5c6   : > { %v2533_v56 = vpop.f32.mrf.mxu1 }
 0x5c7   : > { %v2537_v57 = vmax.f32 %v2460_v54, %v2533_v56  ;;  %v2885_v54 = vld [vmem:[%s6545_s10 + $0x70] sm:$0xff]  ;;  %v2883_v56 = vld [vmem:[%s6545_s10 + $0x60] sm:$0xff] }
 0x5c8   : > { %v5074_v58 = vpop.f32.mrf.mxu1 }
 0x5c9   : > { %5108 = vmatmul.mubr.f32.vlgmr.msra.gmra.mxu1 %v2537_v57  ;;  %5143 = vmatmul.mubr.f32.vlgmr.msra.gmra.mxu0 %v2537_v57  ;;  %v2882_v57 = vld [vmem:[%s6545_s10 + $0x58] sm:$0xff]  ;;  %v2881_v58 = vld [vmem:[%s6545_s10 + $0x50] sm:$0xff] }
 0x5ca   : > { %5147 = vmatprep.mubr.msk.f32.mxu1 %vm5644_vm2, %v5643_v34  ;;  %5176 = vmatprep.mubr.msk.f32.mxu0 %vm5644_vm2, %v5643_v34 }
 0x689   : > { %v2604_v59 = vpop.f32.mrf.mxu1  ;;  %v2674_v60 = vpop.f32.mrf.mxu0 }
 0x68a   : > { %v2678_v61 = vmax.f32 %v2604_v59, %v2674_v60  ;;  %v2880_v59 = vld [vmem:[%s6545_s10 + $0x48] sm:$0xff]  ;;  %v2879_v60 = vld [vmem:[%s6545_s10 + $0x40] sm:$0xff] }
 0x68b   : > { %v5109_v0 = vpop.f32.mrf.mxu1  ;;  %v5144_v2 = vpop.f32.mrf.mxu0 }
 0x68c   : > { %5146 = vmatpush3.msk.msra.mxu1 %vm2692_vm4, %v2678_v61  ;;  %v2878_v61 = vld [vmem:[%s6545_s10 + $0x38] sm:$0xff]  ;;  %v2876_v0 = vld [vmem:[%s6545_s10 + $0x28] sm:$0xff]  ;;  %v2875_v2 = vld [vmem:[%s6545_s10 + $0x20] sm:$0xff] }
 0x68d   : > { %5148 = vmatmul.mubr.msk.f32.vlgmr.msra.gmra.mxu1 %vm2688_vm5, %v2679_v63  ;;  %5150 = vmatprep.subr.mxu1 %v5643_v34  ;;  %v2877_v63 = vld [vmem:[%s6545_s10 + $0x30] sm:$0xff] }
 0x68e   : > { %5151 = vmatpush3.msra.mxu1 %v2687_v3  ;;  %5166 = vmatprep.mubr.msk.f32.mxu1 %vm5644_vm2, %v5643_v34  ;;  %v2874_v3 = vld [vmem:[%s6545_s10 + $0x18] sm:$0xff] }
 0x68f   : > { %5152 = vmatprep.subr.mxu1 %v5643_v34 }
 0x690   : > { %5153 = vmatpush3.msra.mxu1 %v2686_v4  ;;  %v2873_v4 = vld [vmem:[%s6545_s10 + $0x10] sm:$0xff] }
 0x691   : > { %5154 = vmatprep.subr.mxu1 %v5643_v34 }
 0x692   : > { %5155 = vmatpush3.msra.mxu1 %v2685_v5  ;;  %v2872_v5 = vld [vmem:[%s6545_s10 + $0x8] sm:$0xff] }
 0x693   : > { %5156 = vmatprep.subr.mxu1 %v5643_v34 }
 0x694   : > { %5157 = vmatpush3.msra.mxu1 %v2684_v6  ;;  %v2871_v6 = vld [vmem:[%s6545_s10] sm:$0xff] }
 0x695   : > { %5158 = vmatprep.subr.mxu1 %v5643_v34 }
 0x696   : > { %5159 = vmatpush3.msra.mxu1 %v2683_v7  ;;  %v3253_v7 = vld [vmem:[%s6546_s11 + $0x38] sm:$0xff] }
 0x697   : > { %5160 = vmatprep.subr.mxu1 %v5643_v34 }
 0x698   : > { %5161 = vmatpush3.msra.mxu1 %v2682_v8  ;;  %v3261_v8 = vld [vmem:[%s6547_s16 + $0x38] sm:$0xff] }
 0x699   : > { %5162 = vmatprep.subr.mxu1 %v5643_v34 }
 0x69a   : > { %5163 = vmatpush3.msra.mxu1 %v2681_v9 }
 0x69b   : > { %5164 = vmatprep.subr.mxu1 %v5643_v34 }
 0x69c   : > { %5165 = vmatpush3.msra.mxu1 %v2680_v10 }
 0x69d   : > { %5169 = vmatprep.subr.mxu1 %v5643_v34 }
 0x74d   : > { %v2762_v11 = vpop.f32.mrf.mxu1 }
 0x74e   : > { %5167 = vmatmul.mubr.msk.f32.vlgmr.msra.gmra.mxu1 %vm1378_vm1, %v2762_v11  ;;  %v3252_v11 = vld [vmem:[%s6546_s11 + $0x30] sm:$0xff] }
 0x74f   : > { %v5149_v12 = vpop.f32.mrf.mxu1  ;;  %5171 = vmatprep.mubr.msk.f32.mxu1 %vm5644_vm2, %v5643_v34 }
 0x750   : > { %v3260_v12 = vld [vmem:[%s6547_s16 + $0x30] sm:$0xff] }
 0x80e   : > { %v6191_v13 = vpop.f32.mrf.mxu1 }
 0x80f   : > { %5170 = vmatpush3.msra.mxu1 %v6191_v13  ;;  %5175 = vmatpush3.msra.mxu0 %v6191_v13 }
 0x810   : > { %v5168_v15 = vpop.f32.mrf.mxu1  ;;  %5172 = vmatmul.mubr.msk.f32.vlgmr.msra.gmra.mxu1 %vm1981_vm3, %v6024_v41  ;;  %5177 = vmatmul.mubr.msk.f32.vlgmr.msra.gmra.mxu0 %vm1981_vm3, %v6037_v45  ;;  %v2868_v41 = vld [vmem:[%s6543_s28 + $0x68] sm:$0xff] }
 0x811   : > { %5179 = vmatprep.subr.mxu0 %v5643_v34  ;;  %5211 = vmatprep.mubr.msk.f32.mxu0 %vm5644_vm2, %v5643_v34  ;;  %v2852_v45 = vld [vmem:[%s6544_s7 + $0x68] sm:$0xff] }
 0x812   : > { %5180 = vmatpush3.msra.mxu0 %v2870_v14  ;;  %5214 = vmatprep.subr.mxu1 %v5643_v34  ;;  %v3251_v15 = vld [vmem:[%s6546_s11 + $0x28] sm:$0xff] }
 0x813   : > { %5181 = vmatprep.subr.mxu0 %v5643_v34  ;;  %5215 = vmatpush3.msra.mxu1 %v2854_v16  ;;  %v3259_v16 = vld [vmem:[%s6547_s16 + $0x28] sm:$0xff] }
 0x814   : > { %5182 = vmatpush3.msra.mxu0 %v2869_v17  ;;  %5216 = vmatprep.subr.mxu1 %v5643_v34  ;;  %v3250_v17 = vld [vmem:[%s6546_s11 + $0x20] sm:$0xff] }
 0x815   : > { %5183 = vmatprep.subr.mxu0 %v5643_v34  ;;  %5217 = vmatpush3.msra.mxu1 %v2853_v18  ;;  %v3258_v18 = vld [vmem:[%s6547_s16 + $0x20] sm:$0xff] }
 0x816   : > { %5184 = vmatpush3.msra.mxu0 %v2868_v41  ;;  %5218 = vmatprep.subr.mxu1 %v5643_v34  ;;  %v3249_v41 = vld [vmem:[%s6546_s11 + $0x18] sm:$0xff] }
 0x817   : > { %5185 = vmatprep.subr.mxu0 %v5643_v34  ;;  %5219 = vmatpush3.msra.mxu1 %v2852_v45  ;;  %v3257_v45 = vld [vmem:[%s6547_s16 + $0x18] sm:$0xff] }
 0x818   : > { %5186 = vmatpush3.msra.mxu0 %v2867_v19  ;;  %5220 = vmatprep.subr.mxu1 %v5643_v34  ;;  %v3248_v19 = vld [vmem:[%s6546_s11 + $0x10] sm:$0xff] }
 0x819   : > { %5187 = vmatprep.subr.mxu0 %v5643_v34  ;;  %5221 = vmatpush3.msra.mxu1 %v2851_v20  ;;  %v3256_v20 = vld [vmem:[%s6547_s16 + $0x10] sm:$0xff] }
 0x81a   : > { %5188 = vmatpush3.msra.mxu0 %v2866_v21  ;;  %5222 = vmatprep.subr.mxu1 %v5643_v34  ;;  %v3247_v21 = vld [vmem:[%s6546_s11 + $0x8] sm:$0xff] }
 0x81b   : > { %5189 = vmatprep.subr.mxu0 %v5643_v34  ;;  %5223 = vmatpush3.msra.mxu1 %v2850_v22  ;;  %v3255_v22 = vld [vmem:[%s6547_s16 + $0x8] sm:$0xff] }
 0x81c   : > { %5190 = vmatpush3.msra.mxu0 %v2865_v23  ;;  %5224 = vmatprep.subr.mxu1 %v5643_v34  ;;  %v3246_v23 = vld [vmem:[%s6546_s11] sm:$0xff] }
 0x81d   : > { %5191 = vmatprep.subr.mxu0 %v5643_v34  ;;  %5225 = vmatpush3.msra.mxu1 %v2849_v24  ;;  %v3254_v24 = vld [vmem:[%s6547_s16] sm:$0xff] }
 0x81e   : > { %5192 = vmatpush3.msra.mxu0 %v2864_v25  ;;  %5226 = vmatprep.subr.mxu1 %v5643_v34  ;;  %v3245_v25 = vld [vmem:[%s6548_s0 + $0x38] sm:$0xff] }
 0x81f   : > { %5193 = vmatprep.subr.mxu0 %v5643_v34  ;;  %5227 = vmatpush3.msra.mxu1 %v2848_v26  ;;  %v3244_v26 = vld [vmem:[%s6548_s0 + $0x30] sm:$0xff] }
 0x820   : > { %5194 = vmatpush3.msra.mxu0 %v2863_v27  ;;  %5228 = vmatprep.subr.mxu1 %v5643_v34  ;;  %v3243_v27 = vld [vmem:[%s6548_s0 + $0x28] sm:$0xff] }
 0x821   : > { %5195 = vmatprep.subr.mxu0 %v5643_v34  ;;  %5229 = vmatpush3.msra.mxu1 %v2847_v28  ;;  %v5590_v28 = vld [vmem:[%s5658_s9] sm:$0xff] }
 0x822   : > { %5196 = vmatpush3.msra.mxu0 %v2862_v29  ;;  %5230 = vmatprep.subr.mxu1 %v5643_v34  ;;  %v3240_v29 = vld [vmem:[%s6548_s0 + $0x10] sm:$0xff] }
 0x823   : > { %5197 = vmatprep.subr.mxu0 %v5643_v34  ;;  %5231 = vmatpush3.msra.mxu1 %v2846_v35  ;;  %v3239_v35 = vld [vmem:[%s6548_s0 + $0x8] sm:$0xff] }
 0x824   : > { %5198 = vmatpush3.msra.mxu0 %v2861_v36  ;;  %5232 = vmatprep.subr.mxu1 %v5643_v34  ;;  %v3238_v36 = vld [vmem:[%s6548_s0] sm:$0xff] }
 0x825   : > { %5199 = vmatprep.subr.mxu0 %v5643_v34  ;;  %5233 = vmatpush3.msra.mxu1 %v2845_v37 }
 0x826   : > { %5200 = vmatpush3.msra.mxu0 %v2860_v38  ;;  %5234 = vmatprep.subr.mxu1 %v5643_v34 }
 0x827   : > { %5201 = vmatprep.subr.mxu0 %v5643_v34  ;;  %5235 = vmatpush3.msra.mxu1 %v2844_v39  ;;  %v3483_v39 = vld [vmem:[%s6549_s1] sm:$0xff] }
 0x828   : > { %5202 = vmatpush3.msra.mxu0 %v2859_v42  ;;  %5236 = vmatprep.subr.mxu1 %v5643_v34 }
 0x829   : > { %5203 = vmatprep.subr.mxu0 %v5643_v34  ;;  %5237 = vmatpush3.msra.mxu1 %v2843_v43 }
 0x82a   : > { %5204 = vmatpush3.msra.mxu0 %v2858_v44  ;;  %5238 = vmatprep.subr.mxu1 %v5643_v34 }
 0x82b   : > { %5205 = vmatprep.subr.mxu0 %v5643_v34  ;;  %5239 = vmatpush3.msra.mxu1 %v2842_v46 }
 0x82c   : > { %5206 = vmatpush3.msra.mxu0 %v2857_v47  ;;  %5240 = vmatprep.subr.mxu1 %v5643_v34 }
 0x82d   : > { %5207 = vmatprep.subr.mxu0 %v5643_v34  ;;  %5241 = vmatpush3.msra.mxu1 %v2841_v48 }
 0x82e   : > { %5208 = vmatpush3.msra.mxu0 %v2856_v49  ;;  %5242 = vmatprep.subr.mxu1 %v5643_v34 }
 0x82f   : > { %5209 = vmatprep.subr.mxu0 %v5643_v34  ;;  %5243 = vmatpush3.msra.mxu1 %v2840_v50 }
 0x830   : > { %5210 = vmatpush3.msra.mxu0 %v2855_v51  ;;  %5244 = vmatprep.subr.mxu1 %v5643_v34 }
 0x831   : > { %5212 = vmatmul.mubr.f32.vlgmr.msra.gmra.mxu0 %v6191_v13  ;;  %5249 = vmatprep.subr.mxu0 %v5643_v34 }
 0x832   : > { %5250 = vmatpush3.msra.mxu0 %v2886_v52  ;;  %5245 = vmatpush3.msra.mxu1 %v2839_v53 }
 0x833   : > { %5251 = vmatprep.subr.mxu0 %v5643_v34  ;;  %5246 = vmatprep.mubr.msk.f32.mxu1 %vm5644_vm2, %v5643_v34 }
 0x834   : > { %5252 = vmatpush3.msra.mxu0 %v2885_v54  ;;  %5281 = vmatprep.mubr.msk.f32.mxu0 %vm5644_vm2, %v5643_v34 }
 0x835   : > { %5253 = vmatprep.subr.mxu0 %v5643_v34  ;;  %5284 = vmatprep.subr.mxu1 %v5643_v34 }
 0x836   : > { %5254 = vmatpush3.msra.mxu0 %v2884_v55  ;;  %v4478_v55 = vld [vmem:[%s6550_s2] ss:$0 sm:$0xff]  ;;  %s6552_s2 = sld [smem:[#allocation21_spill]] }
 0x837   : > { %5255 = vmatprep.subr.mxu0 %v5643_v34 }
 0x838   : > { %5256 = vmatpush3.msra.mxu0 %v2883_v56 }
 0x839   : > { %5257 = vmatprep.subr.mxu0 %v5643_v34 }
 0x83a   : > { %5258 = vmatpush3.msra.mxu0 %v2882_v57 }
 0x83b   : > { %5259 = vmatprep.subr.mxu0 %v5643_v34 }
 0x83c   : > { %5260 = vmatpush3.msra.mxu0 %v2881_v58 }
 0x83d   : > { %5261 = vmatprep.subr.mxu0 %v5643_v34 }
 0x83e   : > { %5262 = vmatpush3.msra.mxu0 %v2880_v59  ;;  %v3484_v59 = vld [vmem:[%s6549_s1 + $0x8] sm:$0xff]  ;;  %s6554_s1 = sld [smem:[#allocation23_spill]] }
 0x83f   : > { %5263 = vmatprep.subr.mxu0 %v5643_v34 }
 0x840   : > { %5264 = vmatpush3.msra.mxu0 %v2879_v60  ;;  %v3492_v60 = vld [vmem:[%s6551_s3 + $0x38] sm:$0xff] }
 0x841   : > { %5265 = vmatprep.subr.mxu0 %v5643_v34 }
 0x842   : > { %5266 = vmatpush3.msra.mxu0 %v2878_v61  ;;  %v3491_v61 = vld [vmem:[%s6551_s3 + $0x30] sm:$0xff] }
 0x843   : > { %5267 = vmatprep.subr.mxu0 %v5643_v34 }
 0x844   : > { %5268 = vmatpush3.msra.mxu0 %v2877_v63  ;;  %v3490_v63 = vld [vmem:[%s6551_s3 + $0x28] sm:$0xff] }
 0x845   : > { %5269 = vmatprep.subr.mxu0 %v5643_v34 }
 0x846   : > { %5270 = vmatpush3.msra.mxu0 %v2876_v0  ;;  %v3489_v0 = vld [vmem:[%s6551_s3 + $0x20] sm:$0xff] }
 0x847   : > { %5271 = vmatprep.subr.mxu0 %v5643_v34 }
 0x848   : > { %5272 = vmatpush3.msra.mxu0 %v2875_v2  ;;  %v3488_v2 = vld [vmem:[%s6551_s3 + $0x18] sm:$0xff] }
 0x849   : > { %5273 = vmatprep.subr.mxu0 %v5643_v34 }
 0x84a   : > { %5274 = vmatpush3.msra.mxu0 %v2874_v3  ;;  %v3487_v3 = vld [vmem:[%s6551_s3 + $0x10] sm:$0xff] }
 0x84b   : > { %5275 = vmatprep.subr.mxu0 %v5643_v34 }
 0x84c   : > { %5276 = vmatpush3.msra.mxu0 %v2873_v4  ;;  %v3486_v4 = vld [vmem:[%s6551_s3 + $0x8] sm:$0xff] }
 0x84d   : > { %5277 = vmatprep.subr.mxu0 %v5643_v34 }
 0x84e   : > { %5278 = vmatpush3.msra.mxu0 %v2872_v5  ;;  %v3485_v5 = vld [vmem:[%s6551_s3] sm:$0xff] }
 0x84f   : > { %5279 = vmatprep.subr.mxu0 %v5643_v34 }
 0x850   : > { %5280 = vmatpush3.msra.mxu0 %v2871_v6 }
 0x851   : > { %5322 = vmatprep.subr.mxu0 %v5643_v34 }
 0x8d0   : > { %v2953_v9 = vpop.f32.mrf.mxu1  ;;  %v3023_v10 = vpop.f32.mrf.mxu0 }
 0x8d1   : > { %5247 = vmatmul.mubr.f32.vlgmr.msra.gmra.mxu1 %v2953_v9  ;;  %5282 = vmatmul.mubr.f32.vlgmr.msra.gmra.mxu0 %v3023_v10  ;;  %v3669_v9 = vld [vmem:[%s6552_s2 + $0x70] sm:$0xff]  ;;  %v3668_v10 = vld [vmem:[%s6552_s2 + $0x68] sm:$0xff] }
 0x8d2   : > { %5285 = vmatpush3.msra.mxu1 %v3253_v7  ;;  %5323 = vmatpush3.msra.mxu0 %v3261_v8  ;;  %v5173_v13 = vpop.f32.mrf.mxu1  ;;  %v5178_v14 = vpop.f32.mrf.mxu0  ;;  %v3670_v8 = vld [vmem:[%s6552_s2 + $0x78] sm:$0xff] }
 0x8d3   : > { %5286 = vmatprep.subr.mxu1 %v5643_v34  ;;  %5324 = vmatprep.subr.mxu0 %v5643_v34  ;;  %v3665_v13 = vld [vmem:[%s6552_s2 + $0x50] sm:$0xff]  ;;  %v3664_v14 = vld [vmem:[%s6552_s2 + $0x48] sm:$0xff] }
 0x8d4   : > { %5287 = vmatpush3.msra.mxu1 %v3252_v11  ;;  %5325 = vmatpush3.msra.mxu0 %v3260_v12  ;;  %v3667_v11 = vld [vmem:[%s6552_s2 + $0x60] sm:$0xff]  ;;  %v3666_v12 = vld [vmem:[%s6552_s2 + $0x58] sm:$0xff] }
 0x8d5   : > { %5288 = vmatprep.subr.mxu1 %v5643_v34  ;;  %5326 = vmatprep.subr.mxu0 %v5643_v34 }
 0x8d6   : > { %5289 = vmatpush3.msra.mxu1 %v3251_v15  ;;  %5327 = vmatpush3.msra.mxu0 %v3259_v16  ;;  %v3663_v15 = vld [vmem:[%s6552_s2 + $0x40] sm:$0xff]  ;;  %v3662_v16 = vld [vmem:[%s6552_s2 + $0x38] sm:$0xff] }
 0x8d7   : > { %5290 = vmatprep.subr.mxu1 %v5643_v34  ;;  %5328 = vmatprep.subr.mxu0 %v5643_v34 }
 0x8d8   : > { %5291 = vmatpush3.msra.mxu1 %v3250_v17  ;;  %5329 = vmatpush3.msra.mxu0 %v3258_v18  ;;  %v3661_v17 = vld [vmem:[%s6552_s2 + $0x30] sm:$0xff]  ;;  %v3660_v18 = vld [vmem:[%s6552_s2 + $0x28] sm:$0xff] }
 0x8d9   : > { %5292 = vmatprep.subr.mxu1 %v5643_v34  ;;  %5330 = vmatprep.subr.mxu0 %v5643_v34 }
 0x8da   : > { %5293 = vmatpush3.msra.mxu1 %v3249_v41  ;;  %5331 = vmatpush3.msra.mxu0 %v3257_v45  ;;  %v3659_v41 = vld [vmem:[%s6552_s2 + $0x20] sm:$0xff]  ;;  %v3658_v45 = vld [vmem:[%s6552_s2 + $0x18] sm:$0xff] }
 0x8db   : > { %5294 = vmatprep.subr.mxu1 %v5643_v34  ;;  %5332 = vmatprep.subr.mxu0 %v5643_v34 }
 0x8dc   : > { %5295 = vmatpush3.msra.mxu1 %v3248_v19  ;;  %5333 = vmatpush3.msra.mxu0 %v3256_v20  ;;  %v3657_v19 = vld [vmem:[%s6552_s2 + $0x10] sm:$0xff]  ;;  %v3656_v20 = vld [vmem:[%s6552_s2 + $0x8] sm:$0xff] }
 0x8dd   : > { %5296 = vmatprep.subr.mxu1 %v5643_v34  ;;  %5334 = vmatprep.subr.mxu0 %v5643_v34 }
 0x8de   : > { %5297 = vmatpush3.msra.mxu1 %v3247_v21  ;;  %5335 = vmatpush3.msra.mxu0 %v3255_v22 }
 0x8df   : > { %5298 = vmatprep.subr.mxu1 %v5643_v34  ;;  %5336 = vmatprep.subr.mxu0 %v5643_v34 }
 0x8e0   : > { %5299 = vmatpush3.msra.mxu1 %v3246_v23  ;;  %5300 = vmatprep.mubr.msk.f32.mxu1 %vm5644_vm2, %v5643_v34  ;;  %v5591_v23 = vld [vmem:[%s5658_s9 + $0x8] sm:$0xff] }
 0x8e1   : > { %5337 = vmatpush3.msra.mxu0 %v3254_v24  ;;  %5338 = vmatprep.mubr.msk.f32.mxu0 %vm5644_vm2, %v5643_v34  ;;  %v5592_v24 = vld [vmem:[%s5663_s13] sm:$0xff] }
 0x8e2   : > { %5301 = vmatmul.mubr.msk.f32.vlgmr.msra.gmra.mxu1 %vm1378_vm1, %v6021_v40  ;;  %5303 = vmatprep.subr.mxu1 %v5643_v34  ;;  %v3242_v40 = vld [vmem:[%s6548_s0 + $0x20] sm:$0xff] }
 0x8e3   : > { %5339 = vmatmul.mubr.msk.f32.vlgmr.msra.gmra.mxu0 %vm1378_vm1, %v6083_v1  ;;  %5304 = vmatpush3.msra.mxu1 %v3245_v25  ;;  %v3241_v1 = vld [vmem:[%s6548_s0 + $0x18] sm:$0xff]  ;;  %s6553_s0 = sld [smem:[#allocation22_spill]] }
 0x8e4   : > { %5305 = vmatprep.subr.mxu1 %v5643_v34  ;;  %5319 = vmatprep.mubr.msk.f32.mxu1 %vm5644_vm2, %v5643_v34 }
 0x8e5   : > { %5306 = vmatpush3.msra.mxu1 %v3244_v26  ;;  %5369 = vmatprep.mubr.msk.f32.mxu0 %vm1215_vm0, %v5590_v28 }
 0x8e6   : > { %5307 = vmatprep.subr.mxu1 %v5643_v34 }
 0x8e7   : > { %5308 = vmatpush3.msra.mxu1 %v3243_v27  ;;  %v5593_v27 = vld [vmem:[%s5663_s13 + $0x8] sm:$0xff] }
 0x8e8   : > { %5309 = vmatprep.subr.mxu1 %v5643_v34 }
 0x8e9   : > { %5310 = vmatpush3.msra.mxu1 %v3242_v40  ;;  %v3686_v25 = vld [vmem:[%s6553_s0 + $0x78] sm:$0xff]  ;;  %v3685_v26 = vld [vmem:[%s6553_s0 + $0x70] sm:$0xff]  ;;  %v3684_v28 = vld [vmem:[%s6553_s0 + $0x68] sm:$0xff] }
 0x8ea   : > { %5311 = vmatprep.subr.mxu1 %v5643_v34  ;;  %v3683_v40 = vld [vmem:[%s6553_s0 + $0x60] sm:$0xff] }
 0x8eb   : > { %5312 = vmatpush3.msra.mxu1 %v3241_v1  ;;  %v3682_v1 = vld [vmem:[%s6553_s0 + $0x58] sm:$0xff] }
 0x8ec   : > { %5313 = vmatprep.subr.mxu1 %v5643_v34 }
 0x8ed   : > { %5314 = vmatpush3.msra.mxu1 %v3240_v29  ;;  %v3681_v29 = vld [vmem:[%s6553_s0 + $0x50] sm:$0xff] }
 0x8ee   : > { %5315 = vmatprep.subr.mxu1 %v5643_v34 }
 0x8ef   : > { %5316 = vmatpush3.msra.mxu1 %v3239_v35  ;;  %v3680_v35 = vld [vmem:[%s6553_s0 + $0x48] sm:$0xff] }
 0x8f0   : > { %5317 = vmatprep.subr.mxu1 %v5643_v34 }
 0x8f1   : > { %5318 = vmatpush3.msra.mxu1 %v3238_v36  ;;  %v3093_v37 = vpop.f32.mrf.mxu0  ;;  %v3679_v36 = vld [vmem:[%s6553_s0 + $0x40] sm:$0xff] }
 0x8f2   : > { %5320 = vmatmul.mubr.msk.f32.vlgmr.msra.gmra.mxu1 %vm1378_vm1, %v6077_v62 }
 0x8f3   : > { %v5213_v38 = vpop.f32.mrf.mxu0  ;;  %5343 = vmatprep.mubr.msk.f32.mxu1 %vm1981_vm3, %v3483_v39  ;;  %v3676_v39 = vld [vmem:[%s6553_s0 + $0x28] sm:$0xff] }
 0x8f4   : > { %v3677_v38 = vld [vmem:[%s6553_s0 + $0x30] sm:$0xff] }
 0x991   : > { %v3163_v42 = vpop.f32.mrf.mxu1  ;;  %v3233_v43 = vpop.f32.mrf.mxu0 }
 0x992   : > { %v3164_v50 = vadd.f32 %v3163_v42, %v3093_v37  ;;  %v3678_v37 = vld [vmem:[%s6553_s0 + $0x38] sm:$0xff]  ;;  %v3675_v42 = vld [vmem:[%s6553_s0 + $0x20] sm:$0xff] }
 0x993   : > { %v5248_v44 = vpop.f32.mrf.mxu1  ;;  %v5283_v46 = vpop.f32.mrf.mxu0 }
 0x994   : > { %v3237_v53 = vadd.f32 %v3233_v43, %v3164_v50  ;;  %v3674_v43 = vld [vmem:[%s6553_s0 + $0x18] sm:$0xff]  ;;  %v3673_v44 = vld [vmem:[%s6553_s0 + $0x10] sm:$0xff]  ;;  %v3672_v46 = vld [vmem:[%s6553_s0 + $0x8] sm:$0xff] }
 0x995   : > { %v3699_v50 = vld [vmem:[%s6554_s1 + $0x60] sm:$0xff] }
 0x9a2   : > { %v3328_v47 = vpop.f32.mrf.mxu1 }
 0x9a3   : > { %v3468_v48 = vpop.f32.mrf.mxu0 }
 0x9a4   : > { %v5302_v49 = vpop.f32.mrf.mxu1 }
 0x9a5   : > { %v5340_v34 = vpop.f32.mrf.mxu0  ;;  %v3701_v49 = vld [vmem:[%s6554_s1 + $0x70] sm:$0xff] }
 0x9a6   : > { %v3700_v34 = vld [vmem:[%s6554_s1 + $0x68] sm:$0xff] }
 0x9b2   : > { %v3398_v51 = vpop.f32.mrf.mxu1 }
 0x9b3   : > { %v3399_v52 = vadd.f32 %v3398_v51, %v3328_v47  ;;  %v3671_v47 = vld [vmem:[%s6553_s0] sm:$0xff]  ;;  %v3698_v51 = vld [vmem:[%s6554_s1 + $0x58] sm:$0xff]  ;;  %s6555_s0 = sld [smem:[#allocation24_spill]] }
 0x9b4   : > { %v5321_v62 = vpop.f32.mrf.mxu1 }
 0x9b5   : > { %v3472_v54 = vadd.f32 %v3468_v48, %v3399_v52  ;;  %v3702_v48 = vld [vmem:[%s6554_s1 + $0x78] sm:$0xff]  ;;  %v3697_v52 = vld [vmem:[%s6554_s1 + $0x50] sm:$0xff]  ;;  %v3696_v62 = vld [vmem:[%s6554_s1 + $0x48] sm:$0xff] }
 0x9b7   : > { %v3473_v56 = vadd.f32 %v3472_v54, %v3237_v53  ;;  %v3695_v53 = vld [vmem:[%s6554_s1 + $0x40] sm:$0xff]  ;;  %v3694_v54 = vld [vmem:[%s6554_s1 + $0x38] sm:$0xff] }
 0x9b9   : > { %v3481_v57 = vadd.f32 %v4478_v55, %v3473_v56  ;;  %v3693_v55 = vld [vmem:[%s6554_s1 + $0x30] sm:$0xff]  ;;  %v3692_v56 = vld [vmem:[%s6554_s1 + $0x28] sm:$0xff] }
 0x9bb   : > { %v3482_v58 = vmax.f32 %v3481_v57, 0.0  ;;  %v3691_v57 = vld [vmem:[%s6554_s1 + $0x20] sm:$0xff] }
 0x9bd   : > { %5341 = vmatprep.subr.mxu1 %v3482_v58 }
 0x9be   : > { %5342 = vmatpush3.msra.mxu1 %v3482_v58  ;;  %v3690_v58 = vld [vmem:[%s6554_s1 + $0x18] sm:$0xff] }
 0x9bf   : > { %5344 = vmatmul.mubr.msk.f32.vlgmr.msra.gmra.mxu1 %vm1981_vm3, %v3484_v59  ;;  %5346 = vmatprep.subr.mxu1 %v3492_v60  ;;  %v3655_v59 = vld [vmem:[%s6552_s2] sm:$0xff] }
 0x9c0   : > { %5347 = vmatpush3.msra.mxu1 %v3492_v60  ;;  %v3689_v60 = vld [vmem:[%s6554_s1 + $0x10] sm:$0xff] }
 0x9c1   : > { %5348 = vmatprep.subr.mxu1 %v3491_v61 }
 0x9c2   : > { %5349 = vmatpush3.msra.mxu1 %v3491_v61  ;;  %v3688_v61 = vld [vmem:[%s6554_s1 + $0x8] sm:$0xff] }
 0x9c3   : > { %5350 = vmatprep.subr.mxu1 %v3490_v63 }
 0x9c4   : > { %5351 = vmatpush3.msra.mxu1 %v3490_v63  ;;  %v4095_v63 = vld [vmem:[%s5833_s27 + $0x38] sm:$0xff] }
 0x9c5   : > { %5352 = vmatprep.subr.mxu1 %v3489_v0 }
 0x9c6   : > { %5353 = vmatpush3.msra.mxu1 %v3489_v0  ;;  %v3687_v0 = vld [vmem:[%s6554_s1] sm:$0xff] }
 0x9c7   : > { %5354 = vmatprep.subr.mxu1 %v3488_v2 }
 0x9c8   : > { %5355 = vmatpush3.msra.mxu1 %v3488_v2  ;;  %v4103_v2 = vld [vmem:[%s5838_s4 + $0x38] sm:$0xff] }
 0x9c9   : > { %5356 = vmatprep.subr.mxu1 %v3487_v3 }
 0x9ca   : > { %5357 = vmatpush3.msra.mxu1 %v3487_v3 }
 0x9cb   : > { %5358 = vmatprep.subr.mxu1 %v3486_v4 }
 0x9cc   : > { %5359 = vmatpush3.msra.mxu1 %v3486_v4 }
 0x9cd   : > { %5360 = vmatprep.subr.mxu1 %v3485_v5 }
 0x9ce   : > { %5361 = vmatpush3.msra.mxu1 %v3485_v5  ;;  %v4094_v5 = vld [vmem:[%s5833_s27 + $0x30] sm:$0xff] }
 0x9cf   : > { %5414 = vmatprep.subr.mxu1 %v3670_v8 }
 0xa7f   : > { %v5345_v6 = vpop.f32.mrf.mxu1 }
 0xa81   : > { %v3565_v7 = vpop.f32.mrf.mxu1 }
 0xa82   : > { %5362 = vmatprep.mubr.msk.f32.mxu1 %vm1378_vm1, %v3565_v7  ;;  %v4093_v7 = vld [vmem:[%s5833_s27 + $0x28] sm:$0xff] }
 0xa83   : > { %5363 = vmatmul.mubr.msk.f32.vlgmr.msra.gmra.mxu1 %vm1378_vm1, %v5345_v6 }
 0xa84   : > { %5415 = vmatpush3.msra.mxu1 %v3670_v8  ;;  %v5594_v8 = vld [vmem:[%s5869_s26] sm:$0xff] }
 0xa85   : > { %5416 = vmatprep.subr.mxu1 %v3669_v9 }
 0xa86   : > { %5417 = vmatpush3.msra.mxu1 %v3669_v9 }
 0xa87   : > { %5418 = vmatprep.subr.mxu1 %v3668_v10 }
 0xa88   : > { %5419 = vmatpush3.msra.mxu1 %v3668_v10  ;;  %v4092_v10 = vld [vmem:[%s5833_s27 + $0x20] sm:$0xff] }
 0xa89   : > { %5420 = vmatprep.subr.mxu1 %v3667_v11 }
 0xa8a   : > { %5421 = vmatpush3.msra.mxu1 %v3667_v11  ;;  %v4102_v11 = vld [vmem:[%s5838_s4 + $0x30] sm:$0xff] }
 0xa8b   : > { %5422 = vmatprep.subr.mxu1 %v3666_v12 }
 0xa8c   : > { %5423 = vmatpush3.msra.mxu1 %v3666_v12  ;;  %v4091_v12 = vld [vmem:[%s5833_s27 + $0x18] sm:$0xff] }
 0xa8d   : > { %5424 = vmatprep.subr.mxu1 %v3665_v13 }
 0xa8e   : > { %5425 = vmatpush3.msra.mxu1 %v3665_v13  ;;  %v4101_v13 = vld [vmem:[%s5838_s4 + $0x28] sm:$0xff] }
 0xa8f   : > { %5426 = vmatprep.subr.mxu1 %v3664_v14 }
 0xa90   : > { %5427 = vmatpush3.msra.mxu1 %v3664_v14  ;;  %v4090_v14 = vld [vmem:[%s5833_s27 + $0x10] sm:$0xff] }
 0xa91   : > { %5428 = vmatprep.subr.mxu1 %v3663_v15 }
 0xa92   : > { %5429 = vmatpush3.msra.mxu1 %v3663_v15  ;;  %v4100_v15 = vld [vmem:[%s5838_s4 + $0x20] sm:$0xff] }
 0xa93   : > { %5430 = vmatprep.subr.mxu1 %v3662_v16 }
 0xa94   : > { %5431 = vmatpush3.msra.mxu1 %v3662_v16  ;;  %v4089_v16 = vld [vmem:[%s5833_s27 + $0x8] sm:$0xff] }
 0xa95   : > { %5432 = vmatprep.subr.mxu1 %v3661_v17 }
 0xa96   : > { %5433 = vmatpush3.msra.mxu1 %v3661_v17  ;;  %v4099_v17 = vld [vmem:[%s5838_s4 + $0x18] sm:$0xff] }
 0xa97   : > { %5434 = vmatprep.subr.mxu1 %v3660_v18 }
 0xa98   : > { %5435 = vmatpush3.msra.mxu1 %v3660_v18  ;;  %v4088_v18 = vld [vmem:[%s5833_s27] sm:$0xff] }
 0xa99   : > { %5436 = vmatprep.subr.mxu1 %v3659_v41 }
 0xa9a   : > { %5437 = vmatpush3.msra.mxu1 %v3659_v41  ;;  %v4087_v41 = vld [vmem:[%s6555_s0 + $0x38] sm:$0xff] }
 0xa9b   : > { %5438 = vmatprep.subr.mxu1 %v3658_v45 }
 0xa9c   : > { %5439 = vmatpush3.msra.mxu1 %v3658_v45  ;;  %v4097_v45 = vld [vmem:[%s5838_s4 + $0x8] sm:$0xff] }
 0xa9d   : > { %5440 = vmatprep.subr.mxu1 %v3657_v19 }
 0xa9e   : > { %5441 = vmatpush3.msra.mxu1 %v3657_v19  ;;  %v5595_v19 = vld [vmem:[%s5869_s26 + $0x8] sm:$0xff]  ;;  %s6556_s26 = sshll.u32 %s6558_s23, 4 }
 0xa9f   : > { %5442 = vmatprep.subr.mxu1 %v3656_v20 }
 0xaa0   : > { %5443 = vmatpush3.msra.mxu1 %v3656_v20  ;;  %v4086_v20 = vld [vmem:[%s6555_s0 + $0x30] sm:$0xff] }
 0xaa1   : > { %5444 = vmatprep.subr.mxu1 %v3655_v59 }
 0xaa2   : > { %5445 = vmatpush3.msra.mxu1 %v3655_v59 }
 0xaa3   : > { %5484 = vmatprep.subr.mxu1 %v4095_v63 }
 0xb43   : > { %v6394_v21 = vpop.f32.mrf.mxu1 }
 0xb44   : > { %5365 = vmatprep.subr.mxu0 %v6394_v21 }
 0xb45   : > { %v3646_v22 = vpop.f32.mrf.mxu1  ;;  %5366 = vmatpush3.msra.mxu0 %v6394_v21 }
 0xb46   : > { %5367 = vmatprep.subr.mxu0 %v3646_v22 }
 0xb47   : > { %5368 = vmatpush3.msra.mxu0 %v3646_v22 }
 0xb48   : > { %5370 = vmatmul.mubr.msk.f32.vlgmr.msra.gmra.mxu0 %vm1215_vm0, %v5591_v23  ;;  %5372 = vmatprep.subr.mxu0 %v6394_v21  ;;  %v4084_v23 = vld [vmem:[%s6555_s0 + $0x20] sm:$0xff] }
 0xb49   : > { %5373 = vmatpush3.msra.mxu0 %v6394_v21  ;;  %5376 = vmatprep.mubr.msk.f32.mxu0 %vm1215_vm0, %v5592_v24  ;;  %v4083_v24 = vld [vmem:[%s6555_s0 + $0x18] sm:$0xff] }
 0xb4a   : > { %5374 = vmatprep.subr.mxu0 %v3646_v22 }
 0xb4b   : > { %5375 = vmatpush3.msra.mxu0 %v3646_v22 }
 0xb4c   : > { %5377 = vmatmul.mubr.msk.f32.vlgmr.msra.gmra.mxu0 %vm1215_vm0, %v5593_v27  ;;  %5379 = vmatprep.subr.mxu0 %v3686_v25 }
 0xb4d   : > { %5380 = vmatpush3.msra.mxu0 %v3686_v25  ;;  %5411 = vmatprep.mubr.f32.mxu0 %v3646_v22  ;;  %v4085_v22 = vld [vmem:[%s6555_s0 + $0x28] sm:$0xff]  ;;  %v4082_v25 = vld [vmem:[%s6555_s0 + $0x10] sm:$0xff] }
 0xb4e   : > { %5381 = vmatprep.subr.mxu0 %v3685_v26 }
 0xb4f   : > { %5382 = vmatpush3.msra.mxu0 %v3685_v26  ;;  %v4080_v26 = vld [vmem:[%s6555_s0] sm:$0xff] }
 0xb50   : > { %5383 = vmatprep.subr.mxu0 %v3684_v28 }
 0xb51   : > { %5384 = vmatpush3.msra.mxu0 %v3684_v28 }
 0xb52   : > { %5385 = vmatprep.subr.mxu0 %v3683_v40 }
 0xb53   : > { %5386 = vmatpush3.msra.mxu0 %v3683_v40 }
 0xb54   : > { %5387 = vmatprep.subr.mxu0 %v3682_v1 }
 0xb55   : > { %5388 = vmatpush3.msra.mxu0 %v3682_v1 }
 0xb56   : > { %5389 = vmatprep.subr.mxu0 %v3681_v29 }
 0xb57   : > { %5390 = vmatpush3.msra.mxu0 %v3681_v29 }
 0xb58   : > { %5391 = vmatprep.subr.mxu0 %v3680_v35 }
 0xb59   : > { %5392 = vmatpush3.msra.mxu0 %v3680_v35 }
 0xb5a   : > { %5393 = vmatprep.subr.mxu0 %v3679_v36 }
 0xb5b   : > { %5394 = vmatpush3.msra.mxu0 %v3679_v36 }
 0xb5c   : > { %5395 = vmatprep.subr.mxu0 %v3678_v37 }
 0xb5d   : > { %5396 = vmatpush3.msra.mxu0 %v3678_v37 }
 0xb5e   : > { %5397 = vmatprep.subr.mxu0 %v3677_v38 }
 0xb5f   : > { %5398 = vmatpush3.msra.mxu0 %v3677_v38 }
 0xb60   : > { %5399 = vmatprep.subr.mxu0 %v3676_v39 }
 0xb61   : > { %5400 = vmatpush3.msra.mxu0 %v3676_v39 }
 0xb62   : > { %5401 = vmatprep.subr.mxu0 %v3675_v42 }
 0xb63   : > { %5402 = vmatpush3.msra.mxu0 %v3675_v42 }
 0xb64   : > { %5403 = vmatprep.subr.mxu0 %v3674_v43 }
 0xb65   : > { %5404 = vmatpush3.msra.mxu0 %v3674_v43 }
 0xb66   : > { %5405 = vmatprep.subr.mxu0 %v3673_v44 }
 0xb67   : > { %5406 = vmatpush3.msra.mxu0 %v3673_v44 }
 0xb68   : > { %5407 = vmatprep.subr.mxu0 %v3672_v46 }
 0xb69   : > { %5408 = vmatpush3.msra.mxu0 %v3672_v46 }
 0xb6a   : > { %5409 = vmatprep.subr.mxu0 %v3671_v47 }
 0xb6b   : > { %5410 = vmatpush3.msra.mxu0 %v3671_v47 }
 0xb6c   : > { %5412 = vmatmul.mubr.f32.vlgmr.msra.gmra.mxu0 %v6394_v21  ;;  %5449 = vmatprep.subr.mxu0 %v3702_v48  ;;  %v4096_v21 = vld [vmem:[%s5838_s4] sm:$0xff] }
 0xb6d   : > { %5450 = vmatpush3.msra.mxu0 %v3702_v48 }
 0xb6e   : > { %5451 = vmatprep.subr.mxu0 %v3701_v49 }
 0xb6f   : > { %5452 = vmatpush3.msra.mxu0 %v3701_v49  ;;  %v4493_v49 = vld [vmem:[%s5843_s6] ss:$0 sm:$0xff] }
 0xb70   : > { %5453 = vmatprep.subr.mxu0 %v3700_v34 }
 0xb71   : > { %5454 = vmatpush3.msra.mxu0 %v3700_v34 }
 0xb72   : > { %5455 = vmatprep.subr.mxu0 %v3699_v50 }
 0xb73   : > { %5456 = vmatpush3.msra.mxu0 %v3699_v50 }
 0xb74   : > { %5457 = vmatprep.subr.mxu0 %v3698_v51 }
 0xb75   : > { %5458 = vmatpush3.msra.mxu0 %v3698_v51 }
 0xb76   : > { %5459 = vmatprep.subr.mxu0 %v3697_v52 }
 0xb77   : > { %5460 = vmatpush3.msra.mxu0 %v3697_v52 }
 0xb78   : > { %5461 = vmatprep.subr.mxu0 %v3696_v62 }
 0xb79   : > { %5462 = vmatpush3.msra.mxu0 %v3696_v62 }
 0xb7a   : > { %5463 = vmatprep.subr.mxu0 %v3695_v53 }
 0xb7b   : > { %5464 = vmatpush3.msra.mxu0 %v3695_v53 }
 0xb7c   : > { %5465 = vmatprep.subr.mxu0 %v3694_v54 }
 0xb7d   : > { %5466 = vmatpush3.msra.mxu0 %v3694_v54 }
 0xb7e   : > { %5467 = vmatprep.subr.mxu0 %v3693_v55 }
 0xb7f   : > { %5468 = vmatpush3.msra.mxu0 %v3693_v55 }
 0xb80   : > { %5469 = vmatprep.subr.mxu0 %v3692_v56 }
 0xb81   : > { %5470 = vmatpush3.msra.mxu0 %v3692_v56 }
 0xb82   : > { %5471 = vmatprep.subr.mxu0 %v3691_v57 }
 0xb83   : > { %5472 = vmatpush3.msra.mxu0 %v3691_v57 }
 0xb84   : > { %5473 = vmatprep.subr.mxu0 %v3690_v58 }
 0xb85   : > { %5474 = vmatpush3.msra.mxu0 %v3690_v58 }
 0xb86   : > { %5475 = vmatprep.subr.mxu0 %v3689_v60 }
 0xb87   : > { %5476 = vmatpush3.msra.mxu0 %v3689_v60 }
 0xb88   : > { %5477 = vmatprep.subr.mxu0 %v3688_v61 }
 0xb89   : > { %5478 = vmatpush3.msra.mxu0 %v3688_v61 }
 0xb8a   : > { %5479 = vmatprep.subr.mxu0 %v3687_v0 }
 0xb8b   : > { %5480 = vmatpush3.msra.mxu0 %v3687_v0 }
 0xb8c   : > { %5522 = vmatprep.subr.mxu0 %v4103_v2 }
 0xc08   : > { %v5371_v3 = vpop.f32.mrf.mxu0 }
 0xc0a   : > { %v3769_v4 = vpop.f32.mrf.mxu0 }
 0xc0b   : > { %5446 = vmatprep.mubr.f32.mxu1 %v3769_v4 }
 0xc0c   : > { %v5378_v6 = vpop.f32.mrf.mxu0  ;;  %5447 = vmatmul.mubr.f32.vlgmr.msra.gmra.mxu1 %v5371_v3 }
 0xc0d   : > { %5485 = vmatpush3.msra.mxu1 %v4095_v63  ;;  %5500 = vmatprep.mubr.msk.f32.mxu1 %vm1378_vm1, %v5594_v8 }
 0xc0e   : > { %5486 = vmatprep.subr.mxu1 %v4094_v5  ;;  %v3844_v9 = vpop.f32.mrf.mxu0 }
 0xc0f   : > { %5487 = vmatpush3.msra.mxu1 %v4094_v5  ;;  %5481 = vmatprep.mubr.f32.mxu0 %v3844_v9 }
 0xc10   : > { %5488 = vmatprep.subr.mxu1 %v4093_v7  ;;  %5482 = vmatmul.mubr.f32.vlgmr.msra.gmra.mxu0 %v5378_v6 }
 0xc11   : > { %5489 = vmatpush3.msra.mxu1 %v4093_v7  ;;  %5523 = vmatpush3.msra.mxu0 %v4103_v2 }
 0xc12   : > { %5490 = vmatprep.subr.mxu1 %v4092_v10  ;;  %5524 = vmatprep.subr.mxu0 %v4102_v11 }
 0xc13   : > { %5538 = vmatprep.mubr.msk.f32.mxu0 %vm1378_vm1, %v5912_v33  ;;  %5491 = vmatpush3.msra.mxu1 %v4092_v10  ;;  %v4098_v33 = vld [vmem:[%s5838_s4 + $0x10] sm:$0xff] }
 0xc14   : > { %5525 = vmatpush3.msra.mxu0 %v4102_v11  ;;  %5492 = vmatprep.subr.mxu1 %v4091_v12 }
 0xc15   : > { %5526 = vmatprep.subr.mxu0 %v4101_v13  ;;  %5493 = vmatpush3.msra.mxu1 %v4091_v12 }
 0xc16   : > { %5527 = vmatpush3.msra.mxu0 %v4101_v13  ;;  %5494 = vmatprep.subr.mxu1 %v4090_v14 }
 0xc17   : > { %5528 = vmatprep.subr.mxu0 %v4100_v15  ;;  %5495 = vmatpush3.msra.mxu1 %v4090_v14 }
 0xc18   : > { %5529 = vmatpush3.msra.mxu0 %v4100_v15  ;;  %5496 = vmatprep.subr.mxu1 %v4089_v16 }
 0xc19   : > { %5530 = vmatprep.subr.mxu0 %v4099_v17  ;;  %5497 = vmatpush3.msra.mxu1 %v4089_v16 }
 0xc1a   : > { %5531 = vmatpush3.msra.mxu0 %v4099_v17  ;;  %5498 = vmatprep.subr.mxu1 %v4088_v18 }
 0xc1b   : > { %5532 = vmatprep.subr.mxu0 %v4098_v33  ;;  %5499 = vmatpush3.msra.mxu1 %v4088_v18 }
 0xc1c   : > { %5533 = vmatpush3.msra.mxu0 %v4098_v33  ;;  %5501 = vmatmul.mubr.msk.f32.vlgmr.msra.gmra.mxu1 %vm1378_vm1, %v5595_v19 }
 0xc1d   : > { %5503 = vmatprep.subr.mxu1 %v4087_v41  ;;  %5534 = vmatprep.subr.mxu0 %v4097_v45 }
 0xc1e   : > { %5504 = vmatpush3.msra.mxu1 %v4087_v41  ;;  %5519 = vmatprep.mubr.msk.f32.mxu1 %vm1378_vm1, %v5904_v31  ;;  %v4081_v31 = vld [vmem:[%s6555_s0 + $0x8] sm:$0xff]  ;;  %s1182_s0 = scalar_lea.vmem %s5848_s21, %s6556_s26 }
 0xc1f   : > { %5535 = vmatpush3.msra.mxu0 %v4097_v45  ;;  %5505 = vmatprep.subr.mxu1 %v4086_v20 }
 0xc20   : > { %5536 = vmatprep.subr.mxu0 %v4096_v21  ;;  %5506 = vmatpush3.msra.mxu1 %v4086_v20 }
 0xc21   : > { %5537 = vmatpush3.msra.mxu0 %v4096_v21  ;;  %5507 = vmatprep.subr.mxu1 %v4085_v22 }
 0xc22   : > { %5539 = vmatmul.mubr.msk.f32.vlgmr.msra.gmra.mxu0 %vm1378_vm1, %v5908_v32  ;;  %5508 = vmatpush3.msra.mxu1 %v4085_v22 }
 0xc23   : > { %5509 = vmatprep.subr.mxu1 %v4084_v23 }
 0xc24   : > { %5510 = vmatpush3.msra.mxu1 %v4084_v23 }
 0xc25   : > { %5511 = vmatprep.subr.mxu1 %v4083_v24 }
 0xc26   : > { %5512 = vmatpush3.msra.mxu1 %v4083_v24 }
 0xc27   : > { %5513 = vmatprep.subr.mxu1 %v4082_v25 }
 0xc28   : > { %5514 = vmatpush3.msra.mxu1 %v4082_v25 }
 0xc29   : > { %5515 = vmatprep.subr.mxu1 %v4081_v31 }
 0xc2a   : > { %5516 = vmatpush3.msra.mxu1 %v4081_v31 }
 0xc2b   : > { %5517 = vmatprep.subr.mxu1 %v4080_v26 }
 0xc2c   : > { %5518 = vmatpush3.msra.mxu1 %v4080_v26  ;;  %v5413_v27 = vpop.f32.mrf.mxu0 }
 0xc2d   : > { %5520 = vmatmul.mubr.msk.f32.vlgmr.msra.gmra.mxu1 %vm1378_vm1, %v5902_v30 }
 0xc2e   : > { %v3919_v28 = vpop.f32.mrf.mxu0 }
 0xccc   : > { %v5448_v32 = vpop.f32.mrf.mxu1 }
 0xccd   : > { %v4000_v39 = vadd.f32 %v5448_v32, %v5413_v27 }
 0xcce   : > { %v3994_v40 = vpop.f32.mrf.mxu1 }
 0xccf   : > { %v3995_v44 = vadd.f32 %v3994_v40, %v3919_v28 }
 0xcd0   : > { %v5483_v1 = vpop.f32.mrf.mxu0 }
 0xcd1   : > { %v4079_v46 = vadd.f32 %v5483_v1, %v4000_v39 }
 0xcd2   : > { %v4069_v35 = vpop.f32.mrf.mxu0 }
 0xcd3   : > { %v4078_v34 = vadd.f32 %v4069_v35, %v3995_v44 }
 0xcdc   : > { %v5502_v29 = vpop.f32.mrf.mxu1 }
 0xcde   : > { %v4170_v36 = vpop.f32.mrf.mxu1 }
 0xce2   : > { %v5540_v37 = vpop.f32.mrf.mxu0 }
 0xce4   : > { %v4320_v48 = vpop.f32.mrf.mxu0 }
 0xced   : > { %v5521_v38 = vpop.f32.mrf.mxu1 }
 0xcee   : > { %v4251_v42 = vadd.f32 %v5521_v38, %v5502_v29 }
 0xcef   : > { %v4245_v43 = vpop.f32.mrf.mxu1 }
 0xcf0   : > { %v4330_v47 = vadd.f32 %v5540_v37, %v4251_v42  ;;  %v4246_v30 = vadd.f32 %v4245_v43, %v4170_v36 }
 0xcf2   : > { %v4332_v50 = vadd.f32 %v4330_v47, %v4079_v46  ;;  %v4329_v51 = vadd.f32 %v4320_v48, %v4246_v30 }
 0xcf4   : > { %v4341_v52 = vadd.f32 %v4493_v49, %v4332_v50  ;;  %v4331_v62 = vadd.f32 %v4329_v51, %v4078_v34 }
 0xcf6   : > { %v4343_v53 = vmax.f32 %v4341_v52, 0.0  ;;  %v4340_v54 = vadd.f32 %v4493_v49, %v4331_v62 }
 0xcf8   : > { %4345 = vst.msk [vmem:[%s1182_s0 + $0x8] sm:$0xff] %vm1378_vm1, %v4343_v53  ;;  %v4342_v55 = vmax.f32 %v4340_v54, 0.0 }
 0xcfa   : > { %4344 = vst.msk [vmem:[%s1182_s0] sm:$0xff] %vm1378_vm1, %v4342_v55 }
 0xcfb PF: > { %s89_s22 = sadd.s32 1, %s5602_s22  }
 0xcfc   : > { %p86_p4 = scmp.ge.s32.totalorder %s89_s22, 4  }
 0xcfe   :  { %88 = sbr.rel (!%p86_p4) target bundleno = 69 (0x45), region = 245 }

</bundles_post_ra>
